<compile_context>
chip_gen: v7x
topology: tpu7x:2x2x1
jax: 0.10.0
libtpu: 0.0.40
codegen_flags: <defaults>
</compile_context>

<pallas_src>
import math
import jax
import jax.numpy as jnp
from jax.experimental import pallas as pl
from jax.experimental.pallas import tpu as pltpu

# ----- sizes (small, consistent with the module) -----
B, S, H = 2, 8, 32          # batch, seq, hidden_size
NH = 4                      # num_attention_heads
DH = H // NH                # attention_head_size
INNER = 64                  # inner_size
EPS = 1e-12

E0 = 3 * H                  # offset of the extra (order/dist) columns
WIDTH = 3 * H + 4 * NH      # fused projection width = 112 lanes (< 128)


def _layernorm(x, w, b):
    u = jnp.mean(x, axis=-1, keepdims=True)
    s = jnp.mean((x - u) ** 2, axis=-1, keepdims=True)
    return w * ((x - u) / jnp.sqrt(s + EPS)) + b


def _gelu(x):
    return x * 0.5 * (1.0 + jax.lax.erf(x / math.sqrt(2.0)))


def decoder_layer_kernel(
    x_ref,        # [B*S, H]
    mask_ref,     # [B, S, S]
    gd_ref,       # [2, S, S]   (gd_order, gd_distance * |scalar|/sqrt(2))
    wqkv_ref,     # [H, WIDTH]
    bqkv_ref,     # [1, WIDTH]
    wd_ref, bd_ref,
    ln1w_ref, ln1b_ref,
    w1_ref, b1_ref, w2_ref, b2_ref,
    ln2w_ref, ln2b_ref,
    out_ref,      # [B*S, H]
):
    x = x_ref[...]                                             # [16, 32]

    # One MXU matmul: Q | K | V | oq | dq | ok | dk for both batches at once.
    qkv = jnp.dot(x, wqkv_ref[...], preferred_element_type=jnp.float32) + bqkv_ref[0]

    q = qkv[:, 0:H]
    k = qkv[:, H:2 * H]
    v = qkv[:, 2 * H:3 * H]
    oq_all = qkv[:, E0:E0 + NH]                 # order affine, query side
    dq_all = qkv[:, E0 + NH:E0 + 2 * NH]        # distance affine, query side
    ok_all = qkv[:, E0 + 2 * NH:E0 + 3 * NH]    # order affine, key side
    dk_all = qkv[:, E0 + 3 * NH:E0 + 4 * NH]    # distance affine, key side

    gd_order = gd_ref[0]                        # [S, S], 0/1
    gd_dist = gd_ref[1]                         # [S, S], already scaled

    wd = wd_ref[...]
    bd = bd_ref[0]
    ln1w = ln1w_ref[0]
    ln1b = ln1b_ref[0]
    inv_sqrt_dh = 1.0 / math.sqrt(DH)

    attn_parts = []
    for b in range(B):                          # static (B=2), fully unrolled
        r0 = b * S
        xb = x[r0:r0 + S, :]
        mask_b = mask_ref[b]
        oq_b = oq_all[r0:r0 + S, :]             # [S, NH]
        dq_b = dq_all[r0:r0 + S, :]
        okT_b = ok_all[r0:r0 + S, :].T          # [NH, S] (one small relayout)
        dkT_b = dk_all[r0:r0 + S, :].T

        ctx_proj = jnp.zeros((S, H), jnp.float32)
        for h in range(NH):                     # static (NH=4), fully unrolled
            c0 = h * DH
            qh = q[r0:r0 + S, c0:c0 + DH]
            kh = k[r0:r0 + S, c0:c0 + DH]
            vh = v[r0:r0 + S, c0:c0 + DH]

            scores = jax.lax.dot_general(
                qh, kh, (((1,), (1,)), ((), ())),
                preferred_element_type=jnp.float32)            # [S, S]

            # order / distance error terms (affines folded into the fused proj)
            pr_order = jax.nn.sigmoid(oq_b[:, h:h + 1] + okT_b[h:h + 1, :])
            sel = jnp.where(gd_order > 0.0, pr_order, 1.0 - pr_order)
            err_order = jnp.log(sel + 1e-24)                   # one log/head

            pr_dist = dq_b[:, h:h + 1] + dkT_b[h:h + 1, :]     # pre-scaled
            err_dist = -jnp.square(gd_dist - pr_dist)

            scores = (scores + err_order + err_dist) * inv_sqrt_dh + mask_b

            m = jnp.max(scores, axis=-1, keepdims=True)
            e = jnp.exp(scores - m)
            probs = e / jnp.sum(e, axis=-1, keepdims=True)

            ctx_h = jnp.dot(probs, vh, preferred_element_type=jnp.float32)
            # fold the head concat directly into the output projection
            ctx_proj = ctx_proj + jnp.dot(
                ctx_h, wd[c0:c0 + DH, :], preferred_element_type=jnp.float32)

        attn_parts.append(_layernorm(ctx_proj + bd + xb, ln1w, ln1b))

    attn = jnp.concatenate(attn_parts, axis=0)                 # [B*S, H]

    # feed-forward on both batches at once
    h1 = _gelu(jnp.dot(attn, w1_ref[...], preferred_element_type=jnp.float32)
               + b1_ref[0])
    h2 = jnp.dot(h1, w2_ref[...], preferred_element_type=jnp.float32) + b2_ref[0]
    out_ref[...] = _layernorm(attn + h2, ln2w_ref[0], ln2b_ref[0])


def _pack_inputs(x, mask, params):
    """Wrapper-side parameter fusion (pure JAX, one-time)."""
    (wq, bq, wk, bk, wv, bv, ordw, distw, scal, wd, bd,
     ln1w, ln1b, w1, b1, w2, b2, ln2w, ln2b) = params
    HP = jax.lax.Precision.HIGHEST

    ord_b = scal[0]
    dist_b = scal[1]
    s = jnp.abs(scal[2]) * jnp.float32(math.sqrt(0.5))   # sqrt(scalar^2 / 2)

    ordw_q, ordw_k = ordw[0, :DH], ordw[0, DH:]
    distw_q, distw_k = distw[0, :DH], distw[0, DH:]

    wq_h = wq.reshape(H, NH, DH)
    wk_h = wk.reshape(H, NH, DH)
    bq_h = bq.reshape(NH, DH)
    bk_h = bk.reshape(NH, DH)

    # extra projection columns (one per head per term)
    oq_w = jnp.einsum("hnd,d->hn", wq_h, ordw_q, precision=HP)
    dq_w = jnp.einsum("hnd,d->hn", wq_h, distw_q, precision=HP) * s
    ok_w = jnp.einsum("hnd,d->hn", wk_h, ordw_k, precision=HP)
    dk_w = jnp.einsum("hnd,d->hn", wk_h, distw_k, precision=HP) * s
    w_fused = jnp.concatenate([wq, wk, wv, oq_w, dq_w, ok_w, dk_w], axis=1)

    oq_bias = jnp.dot(bq_h, ordw_q, precision=HP) + ord_b
    dq_bias = (jnp.dot(bq_h, distw_q, precision=HP) + dist_b) * s
    ok_bias = jnp.dot(bk_h, ordw_k, precision=HP)
    dk_bias = jnp.dot(bk_h, distw_k, precision=HP) * s
    b_fused = jnp.concatenate(
        [bq[0], bk[0], bv[0], oq_bias, dq_bias, ok_bias, dk_bias])[None, :]

    # precomputed ground-truth order / (pre-scaled) distance matrices
    idx = jnp.arange(S, dtype=jnp.float32)
    row = idx[None, :]                  # j
    col = idx[:, None]                  # i
    gd_order = (row > col).astype(jnp.float32)            # triu(diagonal=1)
    gd_dist = jnp.log(jnp.abs(row - col) + 1.0) * s
    gd = jnp.stack([gd_order, gd_dist], axis=0)            # [2, S, S]

    return (x.reshape(B * S, H), mask.reshape(B, S, S), gd,
            w_fused, b_fused, wd, bd, ln1w, ln1b, w1, b1, w2, b2, ln2w, ln2b)


def run_decoder_layer(x, mask, params):
    args = _pack_inputs(x, mask, params)
    vmem = pl.BlockSpec(memory_space=pltpu.MemorySpace.VMEM)
    out2 = pl.pallas_call(
        decoder_layer_kernel,
        out_shape=jax.ShapeDtypeStruct((B * S, H), jnp.float32),
        in_specs=[vmem] * len(args),
        out_specs=vmem,
    )(*args)
    return out2.reshape(B, S, H)


run_decoder_layer_jit = jax.jit(run_decoder_layer)


# ----- pure-JAX reference (mirrors the PyTorch forward, eval mode) -----
def reference(x, mask, params):
    (wq, bq, wk, bk, wv, bv, ordw, distw, scal, wd, bd,
     ln1w, ln1b, w1, b1, w2, b2, ln2w, ln2b) = params

    def split_heads(t):
        return t.reshape(B, S, NH, DH).transpose(0, 2, 1, 3)

    q = split_heads(x @ wq + bq[0])
    k = split_heads(x @ wk + bk[0])
    v = split_heads(x @ wv + bv[0])

    scores = jnp.einsum("bhid,bhjd->bhij", q, k)

    row = jax.lax.broadcasted_iota(jnp.float32, (S, S), 1)
    col = jax.lax.broadcasted_iota(jnp.float32, (S, S), 0)
    gd_order = jnp.where(row > col, 1.0, 0.0)
    gd_dist = jnp.log(jnp.abs(row - col) + 1.0)

    oq = jnp.einsum("bhid,d->bhi", q, ordw[0, :DH])
    ok = jnp.einsum("bhjd,d->bhj", k, ordw[0, DH:])
    pr_order = jax.nn.sigmoid(oq[..., :, None] + ok[..., None, :] + scal[0])
    err_order = (jnp.log(pr_order + 1e-24) * gd_order
                 + jnp.log(1.0 - pr_order + 1e-24) * (1.0 - gd_order))

    dq = jnp.einsum("bhid,d->bhi", q, distw[0, :DH])
    dk = jnp.einsum("bhjd,d->bhj", k, distw[0, DH:])
    pr_dist = dq[..., :, None] + dk[..., None, :] + scal[1]
    err_dist = -jnp.square(gd_dist - pr_dist) * jnp.square(scal[2]) / 2.0

    scores = (scores + err_order + err_dist) / math.sqrt(DH) + mask
    probs = jax.nn.softmax(scores, axis=-1)
    ctx = jnp.einsum("bhij,bhjd->bhid", probs, v)
    ctx = ctx.transpose(0, 2, 1, 3).reshape(B, S, H)

    attn = _layernorm(ctx @ wd + bd[0] + x, ln1w[0], ln1b[0])
    h1 = _gelu(attn @ w1 + b1[0])
    h2 = h1 @ w2 + b2[0]
    return _layernorm(attn + h2, ln2w[0], ln2b[0])


if __name__ == "__main__":
    key = jax.random.PRNGKey(0)
    ks = jax.random.split(key, 20)

    def w(kk, shape, scale=0.05):
        return (scale * jax.random.normal(kk, shape)).astype(jnp.float32)

    x = w(ks[0], (B, S, H), scale=1.0)
    # causal additive mask [B, 1, S, S]
    causal = jnp.tril(jnp.ones((S, S), jnp.float32))
    mask = ((1.0 - causal) * -10000.0)[None, None].repeat(B, axis=0)

    params = (
        w(ks[1], (H, H)), w(ks[2], (1, H)),            # query
        w(ks[3], (H, H)), w(ks[4], (1, H)),            # key
        w(ks[5], (H, H)), w(ks[6], (1, H)),            # value
        w(ks[7], (1, 2 * DH)),                         # order_affine weight
        w(ks[8], (1, 2 * DH)),                         # distance_affine weight
        jnp.array([0.01, -0.02, 0.5, 0.0], jnp.float32),  # [order_b, dist_b, scalar, pad]
        w(ks[9], (H, H)), w(ks[10], (1, H)),           # dense
        jnp.ones((1, H), jnp.float32), jnp.zeros((1, H), jnp.float32),     # LN1
        w(ks[11], (H, INNER)), w(ks[12], (1, INNER)),  # ffn dense_1
        w(ks[13], (INNER, H)), w(ks[14], (1, H)),      # ffn dense_2
        jnp.ones((1, H), jnp.float32), jnp.zeros((1, H), jnp.float32),     # LN2
    )

    out = run_decoder_layer_jit(x, mask, params)
    out = jax.block_until_ready(out)

    ref = reference(x, mask, params)
    assert out.shape == (B, S, H)
    assert jnp.allclose(out, ref, atol=2e-4, rtol=2e-4), "mismatch vs reference"
    print("KERNEL_OK")
</pallas_src>

<mosaic_0001>
module attributes {stable_mosaic.version = 11 : i64} {
  func.func @decoder_layer_kernel(%arg0: memref<16x32xf32, #tpu.memory_space<vmem>>, %arg1: memref<2x8x8xf32, #tpu.memory_space<vmem>>, %arg2: memref<2x8x8xf32, #tpu.memory_space<vmem>>, %arg3: memref<32x112xf32, #tpu.memory_space<vmem>>, %arg4: memref<1x112xf32, #tpu.memory_space<vmem>>, %arg5: memref<32x32xf32, #tpu.memory_space<vmem>>, %arg6: memref<1x32xf32, #tpu.memory_space<vmem>>, %arg7: memref<1x32xf32, #tpu.memory_space<vmem>>, %arg8: memref<1x32xf32, #tpu.memory_space<vmem>>, %arg9: memref<32x64xf32, #tpu.memory_space<vmem>>, %arg10: memref<1x64xf32, #tpu.memory_space<vmem>>, %arg11: memref<64x32xf32, #tpu.memory_space<vmem>>, %arg12: memref<1x32xf32, #tpu.memory_space<vmem>>, %arg13: memref<1x32xf32, #tpu.memory_space<vmem>>, %arg14: memref<1x32xf32, #tpu.memory_space<vmem>>, %arg15: memref<16x32xf32, #tpu.memory_space<vmem>>) attributes {dimension_semantics = [], scalar_prefetch = 0 : i64, scratch_operands = 0 : i64, tpu.core_type = #tpu.core_type<tc>} {
    %c0 = arith.constant 0 : index
    %c0_0 = arith.constant 0 : index
    %0 = vector.load %arg0[%c0, %c0_0] : memref<16x32xf32, #tpu.memory_space<vmem>>, vector<16x32xf32>
    %c0_1 = arith.constant 0 : index
    %c0_2 = arith.constant 0 : index
    %1 = vector.load %arg3[%c0_1, %c0_2] : memref<32x112xf32, #tpu.memory_space<vmem>>, vector<32x112xf32>
    %cst = arith.constant dense<0.000000e+00> : vector<16x112xf32>
    %2 = tpu.matmul %0, %1, %cst {dimension_numbers = #tpu.dot_dimension_numbers<[1], [0], [0], [1], [0, 0, 1, 1], [], []>} : vector<16x32xf32>, vector<32x112xf32>, vector<16x112xf32> -> vector<16x112xf32>
    %c0_3 = arith.constant 0 : index
    %c0_4 = arith.constant 0 : index
    %3 = vector.load %arg4[%c0_3, %c0_4] : memref<1x112xf32, #tpu.memory_space<vmem>>, vector<1x112xf32>
    %4 = vector.shape_cast %3 : vector<1x112xf32> to vector<112xf32>
    %5 = vector.shape_cast %4 : vector<112xf32> to vector<1x112xf32>
    %6 = vector.broadcast %5 : vector<1x112xf32> to vector<16x112xf32>
    %7 = arith.addf %2, %6 : vector<16x112xf32>
    %8 = vector.extract_strided_slice %7 {offsets = [0, 0], sizes = [16, 32], strides = [1, 1]} : vector<16x112xf32> to vector<16x32xf32>
    %9 = vector.extract_strided_slice %7 {offsets = [0, 32], sizes = [16, 32], strides = [1, 1]} : vector<16x112xf32> to vector<16x32xf32>
    %10 = vector.extract_strided_slice %7 {offsets = [0, 64], sizes = [16, 32], strides = [1, 1]} : vector<16x112xf32> to vector<16x32xf32>
    %11 = vector.extract_strided_slice %7 {offsets = [0, 96], sizes = [16, 4], strides = [1, 1]} : vector<16x112xf32> to vector<16x4xf32>
    %12 = vector.extract_strided_slice %7 {offsets = [0, 100], sizes = [16, 4], strides = [1, 1]} : vector<16x112xf32> to vector<16x4xf32>
    %13 = vector.extract_strided_slice %7 {offsets = [0, 104], sizes = [16, 4], strides = [1, 1]} : vector<16x112xf32> to vector<16x4xf32>
    %14 = vector.extract_strided_slice %7 {offsets = [0, 108], sizes = [16, 4], strides = [1, 1]} : vector<16x112xf32> to vector<16x4xf32>
    %c0_5 = arith.constant 0 : index
    %c0_6 = arith.constant 0 : index
    %c0_7 = arith.constant 0 : index
    %15 = vector.load %arg2[%c0_5, %c0_6, %c0_7] : memref<2x8x8xf32, #tpu.memory_space<vmem>>, vector<1x8x8xf32>
    %16 = vector.shape_cast %15 : vector<1x8x8xf32> to vector<8x8xf32>
    %c1 = arith.constant 1 : index
    %c0_8 = arith.constant 0 : index
    %c0_9 = arith.constant 0 : index
    %17 = vector.load %arg2[%c1, %c0_8, %c0_9] : memref<2x8x8xf32, #tpu.memory_space<vmem>>, vector<1x8x8xf32>
    %18 = vector.shape_cast %17 : vector<1x8x8xf32> to vector<8x8xf32>
    %c0_10 = arith.constant 0 : index
    %c0_11 = arith.constant 0 : index
    %19 = vector.load %arg5[%c0_10, %c0_11] : memref<32x32xf32, #tpu.memory_space<vmem>>, vector<32x32xf32>
    %c0_12 = arith.constant 0 : index
    %c0_13 = arith.constant 0 : index
    %20 = vector.load %arg6[%c0_12, %c0_13] : memref<1x32xf32, #tpu.memory_space<vmem>>, vector<1x32xf32>
    %21 = vector.shape_cast %20 : vector<1x32xf32> to vector<32xf32>
    %c0_14 = arith.constant 0 : index
    %c0_15 = arith.constant 0 : index
    %22 = vector.load %arg7[%c0_14, %c0_15] : memref<1x32xf32, #tpu.memory_space<vmem>>, vector<1x32xf32>
    %23 = vector.shape_cast %22 : vector<1x32xf32> to vector<32xf32>
    %c0_16 = arith.constant 0 : index
    %c0_17 = arith.constant 0 : index
    %24 = vector.load %arg8[%c0_16, %c0_17] : memref<1x32xf32, #tpu.memory_space<vmem>>, vector<1x32xf32>
    %25 = vector.shape_cast %24 : vector<1x32xf32> to vector<32xf32>
    %26 = vector.extract_strided_slice %0 {offsets = [0, 0], sizes = [8, 32], strides = [1, 1]} : vector<16x32xf32> to vector<8x32xf32>
    %c0_18 = arith.constant 0 : index
    %c0_19 = arith.constant 0 : index
    %c0_20 = arith.constant 0 : index
    %27 = vector.load %arg1[%c0_18, %c0_19, %c0_20] : memref<2x8x8xf32, #tpu.memory_space<vmem>>, vector<1x8x8xf32>
    %28 = vector.shape_cast %27 : vector<1x8x8xf32> to vector<8x8xf32>
    %29 = vector.extract_strided_slice %11 {offsets = [0, 0], sizes = [8, 4], strides = [1, 1]} : vector<16x4xf32> to vector<8x4xf32>
    %30 = vector.extract_strided_slice %12 {offsets = [0, 0], sizes = [8, 4], strides = [1, 1]} : vector<16x4xf32> to vector<8x4xf32>
    %31 = vector.extract_strided_slice %13 {offsets = [0, 0], sizes = [8, 4], strides = [1, 1]} : vector<16x4xf32> to vector<8x4xf32>
    %32 = tpu.transpose %31, [1, 0] : vector<8x4xf32> -> vector<4x8xf32>
    %33 = vector.extract_strided_slice %14 {offsets = [0, 0], sizes = [8, 4], strides = [1, 1]} : vector<16x4xf32> to vector<8x4xf32>
    %34 = tpu.transpose %33, [1, 0] : vector<8x4xf32> -> vector<4x8xf32>
    %cst_21 = arith.constant 0.000000e+00 : f32
    %35 = vector.broadcast %cst_21 : f32 to vector<8x32xf32>
    %36 = vector.extract_strided_slice %8 {offsets = [0, 0], sizes = [8, 8], strides = [1, 1]} : vector<16x32xf32> to vector<8x8xf32>
    %37 = vector.extract_strided_slice %9 {offsets = [0, 0], sizes = [8, 8], strides = [1, 1]} : vector<16x32xf32> to vector<8x8xf32>
    %38 = vector.extract_strided_slice %10 {offsets = [0, 0], sizes = [8, 8], strides = [1, 1]} : vector<16x32xf32> to vector<8x8xf32>
    %cst_22 = arith.constant dense<0.000000e+00> : vector<8x8xf32>
    %39 = tpu.matmul %36, %37, %cst_22 {dimension_numbers = #tpu.dot_dimension_numbers<[1], [1], [0], [0], [0, 0, 1, 0], [], []>} : vector<8x8xf32>, vector<8x8xf32>, vector<8x8xf32> -> vector<8x8xf32>
    %40 = vector.extract_strided_slice %29 {offsets = [0, 0], sizes = [8, 1], strides = [1, 1]} : vector<8x4xf32> to vector<8x1xf32>
    %41 = vector.extract_strided_slice %32 {offsets = [0, 0], sizes = [1, 8], strides = [1, 1]} : vector<4x8xf32> to vector<1x8xf32>
    %42 = vector.broadcast %40 : vector<8x1xf32> to vector<8x8xf32>
    %43 = vector.broadcast %41 : vector<1x8xf32> to vector<8x8xf32>
    %44 = arith.addf %42, %43 : vector<8x8xf32>
    %45 = arith.negf %44 : vector<8x8xf32>
    %46 = math.exp %45 : vector<8x8xf32>
    %cst_23 = arith.constant 1.000000e+00 : f32
    %47 = vector.broadcast %cst_23 : f32 to vector<8x8xf32>
    %48 = arith.addf %47, %46 : vector<8x8xf32>
    %49 = arith.divf %47, %48 : vector<8x8xf32>
    %cst_24 = arith.constant 0.000000e+00 : f32
    %50 = vector.broadcast %cst_24 : f32 to vector<8x8xf32>
    %51 = arith.cmpf ogt, %16, %50 : vector<8x8xf32>
    %cst_25 = arith.constant 1.000000e+00 : f32
    %52 = vector.broadcast %cst_25 : f32 to vector<8x8xf32>
    %53 = arith.subf %52, %49 : vector<8x8xf32>
    %54 = arith.select %51, %49, %53 : vector<8x8xi1>, vector<8x8xf32>
    %cst_26 = arith.constant 1.000000e-24 : f32
    %55 = vector.broadcast %cst_26 : f32 to vector<8x8xf32>
    %56 = arith.addf %54, %55 : vector<8x8xf32>
    %57 = math.log %56 : vector<8x8xf32>
    %58 = vector.extract_strided_slice %30 {offsets = [0, 0], sizes = [8, 1], strides = [1, 1]} : vector<8x4xf32> to vector<8x1xf32>
    %59 = vector.extract_strided_slice %34 {offsets = [0, 0], sizes = [1, 8], strides = [1, 1]} : vector<4x8xf32> to vector<1x8xf32>
    %60 = vector.broadcast %58 : vector<8x1xf32> to vector<8x8xf32>
    %61 = vector.broadcast %59 : vector<1x8xf32> to vector<8x8xf32>
    %62 = arith.addf %60, %61 : vector<8x8xf32>
    %63 = arith.subf %18, %62 : vector<8x8xf32>
    %64 = arith.mulf %63, %63 : vector<8x8xf32>
    %cst_27 = arith.constant 0.000000e+00 : f32
    %65 = vector.broadcast %cst_27 : f32 to vector<8x8xf32>
    %66 = arith.subf %65, %64 : vector<8x8xf32>
    %67 = arith.addf %39, %57 : vector<8x8xf32>
    %68 = arith.addf %67, %66 : vector<8x8xf32>
    %cst_28 = arith.constant 0.353553385 : f32
    %69 = vector.broadcast %cst_28 : f32 to vector<8x8xf32>
    %70 = arith.mulf %68, %69 : vector<8x8xf32>
    %71 = arith.addf %70, %28 : vector<8x8xf32>
    %cst_29 = arith.constant dense<0xFF800000> : vector<8xf32>
    %72 = vector.multi_reduction <maximumf>, %71, %cst_29 [1] : vector<8x8xf32> to vector<8xf32>
    %73 = vector.shape_cast %72 : vector<8xf32> to vector<8x1xf32>
    %74 = vector.broadcast %73 : vector<8x1xf32> to vector<8x8xf32>
    %75 = arith.subf %71, %74 : vector<8x8xf32>
    %76 = math.exp %75 : vector<8x8xf32>
    %cst_30 = arith.constant dense<0.000000e+00> : vector<8xf32>
    %77 = vector.multi_reduction <add>, %76, %cst_30 [1] : vector<8x8xf32> to vector<8xf32>
    %78 = vector.shape_cast %77 : vector<8xf32> to vector<8x1xf32>
    %79 = vector.broadcast %78 : vector<8x1xf32> to vector<8x8xf32>
    %80 = arith.divf %76, %79 : vector<8x8xf32>
    %cst_31 = arith.constant dense<0.000000e+00> : vector<8x8xf32>
    %81 = tpu.matmul %80, %38, %cst_31 {dimension_numbers = #tpu.dot_dimension_numbers<[1], [0], [0], [1], [0, 0, 1, 1], [], []>} : vector<8x8xf32>, vector<8x8xf32>, vector<8x8xf32> -> vector<8x8xf32>
    %82 = vector.extract_strided_slice %19 {offsets = [0, 0], sizes = [8, 32], strides = [1, 1]} : vector<32x32xf32> to vector<8x32xf32>
    %cst_32 = arith.constant dense<0.000000e+00> : vector<8x32xf32>
    %83 = tpu.matmul %81, %82, %cst_32 {dimension_numbers = #tpu.dot_dimension_numbers<[1], [0], [0], [1], [0, 0, 1, 1], [], []>} : vector<8x8xf32>, vector<8x32xf32>, vector<8x32xf32> -> vector<8x32xf32>
    %84 = arith.addf %35, %83 : vector<8x32xf32>
    %85 = vector.extract_strided_slice %8 {offsets = [0, 8], sizes = [8, 8], strides = [1, 1]} : vector<16x32xf32> to vector<8x8xf32>
    %86 = vector.extract_strided_slice %9 {offsets = [0, 8], sizes = [8, 8], strides = [1, 1]} : vector<16x32xf32> to vector<8x8xf32>
    %87 = vector.extract_strided_slice %10 {offsets = [0, 8], sizes = [8, 8], strides = [1, 1]} : vector<16x32xf32> to vector<8x8xf32>
    %cst_33 = arith.constant dense<0.000000e+00> : vector<8x8xf32>
    %88 = tpu.matmul %85, %86, %cst_33 {dimension_numbers = #tpu.dot_dimension_numbers<[1], [1], [0], [0], [0, 0, 1, 0], [], []>} : vector<8x8xf32>, vector<8x8xf32>, vector<8x8xf32> -> vector<8x8xf32>
    %89 = vector.extract_strided_slice %29 {offsets = [0, 1], sizes = [8, 1], strides = [1, 1]} : vector<8x4xf32> to vector<8x1xf32>
    %90 = vector.extract_strided_slice %32 {offsets = [1, 0], sizes = [1, 8], strides = [1, 1]} : vector<4x8xf32> to vector<1x8xf32>
    %91 = vector.broadcast %89 : vector<8x1xf32> to vector<8x8xf32>
    %92 = vector.broadcast %90 : vector<1x8xf32> to vector<8x8xf32>
    %93 = arith.addf %91, %92 : vector<8x8xf32>
    %94 = arith.negf %93 : vector<8x8xf32>
    %95 = math.exp %94 : vector<8x8xf32>
    %cst_34 = arith.constant 1.000000e+00 : f32
    %96 = vector.broadcast %cst_34 : f32 to vector<8x8xf32>
    %97 = arith.addf %96, %95 : vector<8x8xf32>
    %98 = arith.divf %96, %97 : vector<8x8xf32>
    %cst_35 = arith.constant 0.000000e+00 : f32
    %99 = vector.broadcast %cst_35 : f32 to vector<8x8xf32>
    %100 = arith.cmpf ogt, %16, %99 : vector<8x8xf32>
    %cst_36 = arith.constant 1.000000e+00 : f32
    %101 = vector.broadcast %cst_36 : f32 to vector<8x8xf32>
    %102 = arith.subf %101, %98 : vector<8x8xf32>
    %103 = arith.select %100, %98, %102 : vector<8x8xi1>, vector<8x8xf32>
    %cst_37 = arith.constant 1.000000e-24 : f32
    %104 = vector.broadcast %cst_37 : f32 to vector<8x8xf32>
    %105 = arith.addf %103, %104 : vector<8x8xf32>
    %106 = math.log %105 : vector<8x8xf32>
    %107 = vector.extract_strided_slice %30 {offsets = [0, 1], sizes = [8, 1], strides = [1, 1]} : vector<8x4xf32> to vector<8x1xf32>
    %108 = vector.extract_strided_slice %34 {offsets = [1, 0], sizes = [1, 8], strides = [1, 1]} : vector<4x8xf32> to vector<1x8xf32>
    %109 = vector.broadcast %107 : vector<8x1xf32> to vector<8x8xf32>
    %110 = vector.broadcast %108 : vector<1x8xf32> to vector<8x8xf32>
    %111 = arith.addf %109, %110 : vector<8x8xf32>
    %112 = arith.subf %18, %111 : vector<8x8xf32>
    %113 = arith.mulf %112, %112 : vector<8x8xf32>
    %cst_38 = arith.constant 0.000000e+00 : f32
    %114 = vector.broadcast %cst_38 : f32 to vector<8x8xf32>
    %115 = arith.subf %114, %113 : vector<8x8xf32>
    %116 = arith.addf %88, %106 : vector<8x8xf32>
    %117 = arith.addf %116, %115 : vector<8x8xf32>
    %cst_39 = arith.constant 0.353553385 : f32
    %118 = vector.broadcast %cst_39 : f32 to vector<8x8xf32>
    %119 = arith.mulf %117, %118 : vector<8x8xf32>
    %120 = arith.addf %119, %28 : vector<8x8xf32>
    %cst_40 = arith.constant dense<0xFF800000> : vector<8xf32>
    %121 = vector.multi_reduction <maximumf>, %120, %cst_40 [1] : vector<8x8xf32> to vector<8xf32>
    %122 = vector.shape_cast %121 : vector<8xf32> to vector<8x1xf32>
    %123 = vector.broadcast %122 : vector<8x1xf32> to vector<8x8xf32>
    %124 = arith.subf %120, %123 : vector<8x8xf32>
    %125 = math.exp %124 : vector<8x8xf32>
    %cst_41 = arith.constant dense<0.000000e+00> : vector<8xf32>
    %126 = vector.multi_reduction <add>, %125, %cst_41 [1] : vector<8x8xf32> to vector<8xf32>
    %127 = vector.shape_cast %126 : vector<8xf32> to vector<8x1xf32>
    %128 = vector.broadcast %127 : vector<8x1xf32> to vector<8x8xf32>
    %129 = arith.divf %125, %128 : vector<8x8xf32>
    %cst_42 = arith.constant dense<0.000000e+00> : vector<8x8xf32>
    %130 = tpu.matmul %129, %87, %cst_42 {dimension_numbers = #tpu.dot_dimension_numbers<[1], [0], [0], [1], [0, 0, 1, 1], [], []>} : vector<8x8xf32>, vector<8x8xf32>, vector<8x8xf32> -> vector<8x8xf32>
    %131 = vector.extract_strided_slice %19 {offsets = [8, 0], sizes = [8, 32], strides = [1, 1]} : vector<32x32xf32> to vector<8x32xf32>
    %cst_43 = arith.constant dense<0.000000e+00> : vector<8x32xf32>
    %132 = tpu.matmul %130, %131, %cst_43 {dimension_numbers = #tpu.dot_dimension_numbers<[1], [0], [0], [1], [0, 0, 1, 1], [], []>} : vector<8x8xf32>, vector<8x32xf32>, vector<8x32xf32> -> vector<8x32xf32>
    %133 = arith.addf %84, %132 : vector<8x32xf32>
    %134 = vector.extract_strided_slice %8 {offsets = [0, 16], sizes = [8, 8], strides = [1, 1]} : vector<16x32xf32> to vector<8x8xf32>
    %135 = vector.extract_strided_slice %9 {offsets = [0, 16], sizes = [8, 8], strides = [1, 1]} : vector<16x32xf32> to vector<8x8xf32>
    %136 = vector.extract_strided_slice %10 {offsets = [0, 16], sizes = [8, 8], strides = [1, 1]} : vector<16x32xf32> to vector<8x8xf32>
    %cst_44 = arith.constant dense<0.000000e+00> : vector<8x8xf32>
    %137 = tpu.matmul %134, %135, %cst_44 {dimension_numbers = #tpu.dot_dimension_numbers<[1], [1], [0], [0], [0, 0, 1, 0], [], []>} : vector<8x8xf32>, vector<8x8xf32>, vector<8x8xf32> -> vector<8x8xf32>
    %138 = vector.extract_strided_slice %29 {offsets = [0, 2], sizes = [8, 1], strides = [1, 1]} : vector<8x4xf32> to vector<8x1xf32>
    %139 = vector.extract_strided_slice %32 {offsets = [2, 0], sizes = [1, 8], strides = [1, 1]} : vector<4x8xf32> to vector<1x8xf32>
    %140 = vector.broadcast %138 : vector<8x1xf32> to vector<8x8xf32>
    %141 = vector.broadcast %139 : vector<1x8xf32> to vector<8x8xf32>
    %142 = arith.addf %140, %141 : vector<8x8xf32>
    %143 = arith.negf %142 : vector<8x8xf32>
    %144 = math.exp %143 : vector<8x8xf32>
    %cst_45 = arith.constant 1.000000e+00 : f32
    %145 = vector.broadcast %cst_45 : f32 to vector<8x8xf32>
    %146 = arith.addf %145, %144 : vector<8x8xf32>
    %147 = arith.divf %145, %146 : vector<8x8xf32>
    %cst_46 = arith.constant 0.000000e+00 : f32
    %148 = vector.broadcast %cst_46 : f32 to vector<8x8xf32>
    %149 = arith.cmpf ogt, %16, %148 : vector<8x8xf32>
    %cst_47 = arith.constant 1.000000e+00 : f32
    %150 = vector.broadcast %cst_47 : f32 to vector<8x8xf32>
    %151 = arith.subf %150, %147 : vector<8x8xf32>
    %152 = arith.select %149, %147, %151 : vector<8x8xi1>, vector<8x8xf32>
    %cst_48 = arith.constant 1.000000e-24 : f32
    %153 = vector.broadcast %cst_48 : f32 to vector<8x8xf32>
    %154 = arith.addf %152, %153 : vector<8x8xf32>
    %155 = math.log %154 : vector<8x8xf32>
    %156 = vector.extract_strided_slice %30 {offsets = [0, 2], sizes = [8, 1], strides = [1, 1]} : vector<8x4xf32> to vector<8x1xf32>
    %157 = vector.extract_strided_slice %34 {offsets = [2, 0], sizes = [1, 8], strides = [1, 1]} : vector<4x8xf32> to vector<1x8xf32>
    %158 = vector.broadcast %156 : vector<8x1xf32> to vector<8x8xf32>
    %159 = vector.broadcast %157 : vector<1x8xf32> to vector<8x8xf32>
    %160 = arith.addf %158, %159 : vector<8x8xf32>
    %161 = arith.subf %18, %160 : vector<8x8xf32>
    %162 = arith.mulf %161, %161 : vector<8x8xf32>
    %cst_49 = arith.constant 0.000000e+00 : f32
    %163 = vector.broadcast %cst_49 : f32 to vector<8x8xf32>
    %164 = arith.subf %163, %162 : vector<8x8xf32>
    %165 = arith.addf %137, %155 : vector<8x8xf32>
    %166 = arith.addf %165, %164 : vector<8x8xf32>
    %cst_50 = arith.constant 0.353553385 : f32
    %167 = vector.broadcast %cst_50 : f32 to vector<8x8xf32>
    %168 = arith.mulf %166, %167 : vector<8x8xf32>
    %169 = arith.addf %168, %28 : vector<8x8xf32>
    %cst_51 = arith.constant dense<0xFF800000> : vector<8xf32>
    %170 = vector.multi_reduction <maximumf>, %169, %cst_51 [1] : vector<8x8xf32> to vector<8xf32>
    %171 = vector.shape_cast %170 : vector<8xf32> to vector<8x1xf32>
    %172 = vector.broadcast %171 : vector<8x1xf32> to vector<8x8xf32>
    %173 = arith.subf %169, %172 : vector<8x8xf32>
    %174 = math.exp %173 : vector<8x8xf32>
    %cst_52 = arith.constant dense<0.000000e+00> : vector<8xf32>
    %175 = vector.multi_reduction <add>, %174, %cst_52 [1] : vector<8x8xf32> to vector<8xf32>
    %176 = vector.shape_cast %175 : vector<8xf32> to vector<8x1xf32>
    %177 = vector.broadcast %176 : vector<8x1xf32> to vector<8x8xf32>
    %178 = arith.divf %174, %177 : vector<8x8xf32>
    %cst_53 = arith.constant dense<0.000000e+00> : vector<8x8xf32>
    %179 = tpu.matmul %178, %136, %cst_53 {dimension_numbers = #tpu.dot_dimension_numbers<[1], [0], [0], [1], [0, 0, 1, 1], [], []>} : vector<8x8xf32>, vector<8x8xf32>, vector<8x8xf32> -> vector<8x8xf32>
    %180 = vector.extract_strided_slice %19 {offsets = [16, 0], sizes = [8, 32], strides = [1, 1]} : vector<32x32xf32> to vector<8x32xf32>
    %cst_54 = arith.constant dense<0.000000e+00> : vector<8x32xf32>
    %181 = tpu.matmul %179, %180, %cst_54 {dimension_numbers = #tpu.dot_dimension_numbers<[1], [0], [0], [1], [0, 0, 1, 1], [], []>} : vector<8x8xf32>, vector<8x32xf32>, vector<8x32xf32> -> vector<8x32xf32>
    %182 = arith.addf %133, %181 : vector<8x32xf32>
    %183 = vector.extract_strided_slice %8 {offsets = [0, 24], sizes = [8, 8], strides = [1, 1]} : vector<16x32xf32> to vector<8x8xf32>
    %184 = vector.extract_strided_slice %9 {offsets = [0, 24], sizes = [8, 8], strides = [1, 1]} : vector<16x32xf32> to vector<8x8xf32>
    %185 = vector.extract_strided_slice %10 {offsets = [0, 24], sizes = [8, 8], strides = [1, 1]} : vector<16x32xf32> to vector<8x8xf32>
    %cst_55 = arith.constant dense<0.000000e+00> : vector<8x8xf32>
    %186 = tpu.matmul %183, %184, %cst_55 {dimension_numbers = #tpu.dot_dimension_numbers<[1], [1], [0], [0], [0, 0, 1, 0], [], []>} : vector<8x8xf32>, vector<8x8xf32>, vector<8x8xf32> -> vector<8x8xf32>
    %187 = vector.extract_strided_slice %29 {offsets = [0, 3], sizes = [8, 1], strides = [1, 1]} : vector<8x4xf32> to vector<8x1xf32>
    %188 = vector.extract_strided_slice %32 {offsets = [3, 0], sizes = [1, 8], strides = [1, 1]} : vector<4x8xf32> to vector<1x8xf32>
    %189 = vector.broadcast %187 : vector<8x1xf32> to vector<8x8xf32>
    %190 = vector.broadcast %188 : vector<1x8xf32> to vector<8x8xf32>
    %191 = arith.addf %189, %190 : vector<8x8xf32>
    %192 = arith.negf %191 : vector<8x8xf32>
    %193 = math.exp %192 : vector<8x8xf32>
    %cst_56 = arith.constant 1.000000e+00 : f32
    %194 = vector.broadcast %cst_56 : f32 to vector<8x8xf32>
    %195 = arith.addf %194, %193 : vector<8x8xf32>
    %196 = arith.divf %194, %195 : vector<8x8xf32>
    %cst_57 = arith.constant 0.000000e+00 : f32
    %197 = vector.broadcast %cst_57 : f32 to vector<8x8xf32>
    %198 = arith.cmpf ogt, %16, %197 : vector<8x8xf32>
    %cst_58 = arith.constant 1.000000e+00 : f32
    %199 = vector.broadcast %cst_58 : f32 to vector<8x8xf32>
    %200 = arith.subf %199, %196 : vector<8x8xf32>
    %201 = arith.select %198, %196, %200 : vector<8x8xi1>, vector<8x8xf32>
    %cst_59 = arith.constant 1.000000e-24 : f32
    %202 = vector.broadcast %cst_59 : f32 to vector<8x8xf32>
    %203 = arith.addf %201, %202 : vector<8x8xf32>
    %204 = math.log %203 : vector<8x8xf32>
    %205 = vector.extract_strided_slice %30 {offsets = [0, 3], sizes = [8, 1], strides = [1, 1]} : vector<8x4xf32> to vector<8x1xf32>
    %206 = vector.extract_strided_slice %34 {offsets = [3, 0], sizes = [1, 8], strides = [1, 1]} : vector<4x8xf32> to vector<1x8xf32>
    %207 = vector.broadcast %205 : vector<8x1xf32> to vector<8x8xf32>
    %208 = vector.broadcast %206 : vector<1x8xf32> to vector<8x8xf32>
    %209 = arith.addf %207, %208 : vector<8x8xf32>
    %210 = arith.subf %18, %209 : vector<8x8xf32>
    %211 = arith.mulf %210, %210 : vector<8x8xf32>
    %cst_60 = arith.constant 0.000000e+00 : f32
    %212 = vector.broadcast %cst_60 : f32 to vector<8x8xf32>
    %213 = arith.subf %212, %211 : vector<8x8xf32>
    %214 = arith.addf %186, %204 : vector<8x8xf32>
    %215 = arith.addf %214, %213 : vector<8x8xf32>
    %cst_61 = arith.constant 0.353553385 : f32
    %216 = vector.broadcast %cst_61 : f32 to vector<8x8xf32>
    %217 = arith.mulf %215, %216 : vector<8x8xf32>
    %218 = arith.addf %217, %28 : vector<8x8xf32>
    %cst_62 = arith.constant dense<0xFF800000> : vector<8xf32>
    %219 = vector.multi_reduction <maximumf>, %218, %cst_62 [1] : vector<8x8xf32> to vector<8xf32>
    %220 = vector.shape_cast %219 : vector<8xf32> to vector<8x1xf32>
    %221 = vector.broadcast %220 : vector<8x1xf32> to vector<8x8xf32>
    %222 = arith.subf %218, %221 : vector<8x8xf32>
    %223 = math.exp %222 : vector<8x8xf32>
    %cst_63 = arith.constant dense<0.000000e+00> : vector<8xf32>
    %224 = vector.multi_reduction <add>, %223, %cst_63 [1] : vector<8x8xf32> to vector<8xf32>
    %225 = vector.shape_cast %224 : vector<8xf32> to vector<8x1xf32>
    %226 = vector.broadcast %225 : vector<8x1xf32> to vector<8x8xf32>
    %227 = arith.divf %223, %226 : vector<8x8xf32>
    %cst_64 = arith.constant dense<0.000000e+00> : vector<8x8xf32>
    %228 = tpu.matmul %227, %185, %cst_64 {dimension_numbers = #tpu.dot_dimension_numbers<[1], [0], [0], [1], [0, 0, 1, 1], [], []>} : vector<8x8xf32>, vector<8x8xf32>, vector<8x8xf32> -> vector<8x8xf32>
    %229 = vector.extract_strided_slice %19 {offsets = [24, 0], sizes = [8, 32], strides = [1, 1]} : vector<32x32xf32> to vector<8x32xf32>
    %cst_65 = arith.constant dense<0.000000e+00> : vector<8x32xf32>
    %230 = tpu.matmul %228, %229, %cst_65 {dimension_numbers = #tpu.dot_dimension_numbers<[1], [0], [0], [1], [0, 0, 1, 1], [], []>} : vector<8x8xf32>, vector<8x32xf32>, vector<8x32xf32> -> vector<8x32xf32>
    %231 = arith.addf %182, %230 : vector<8x32xf32>
    %232 = vector.shape_cast %21 : vector<32xf32> to vector<1x32xf32>
    %233 = vector.broadcast %232 : vector<1x32xf32> to vector<8x32xf32>
    %234 = arith.addf %231, %233 : vector<8x32xf32>
    %235 = arith.addf %234, %26 : vector<8x32xf32>
    %cst_66 = arith.constant dense<0.000000e+00> : vector<8xf32>
    %236 = vector.multi_reduction <add>, %235, %cst_66 [1] : vector<8x32xf32> to vector<8xf32>
    %237 = vector.shape_cast %236 : vector<8xf32> to vector<8x1xf32>
    %cst_67 = arith.constant 3.200000e+01 : f32
    %238 = vector.broadcast %cst_67 : f32 to vector<8x1xf32>
    %239 = arith.divf %237, %238 : vector<8x1xf32>
    %240 = vector.broadcast %239 : vector<8x1xf32> to vector<8x32xf32>
    %241 = arith.subf %235, %240 : vector<8x32xf32>
    %242 = arith.mulf %241, %241 : vector<8x32xf32>
    %cst_68 = arith.constant dense<0.000000e+00> : vector<8xf32>
    %243 = vector.multi_reduction <add>, %242, %cst_68 [1] : vector<8x32xf32> to vector<8xf32>
    %244 = vector.shape_cast %243 : vector<8xf32> to vector<8x1xf32>
    %cst_69 = arith.constant 3.200000e+01 : f32
    %245 = vector.broadcast %cst_69 : f32 to vector<8x1xf32>
    %246 = arith.divf %244, %245 : vector<8x1xf32>
    %247 = vector.broadcast %239 : vector<8x1xf32> to vector<8x32xf32>
    %248 = arith.subf %235, %247 : vector<8x32xf32>
    %cst_70 = arith.constant 9.99999996E-13 : f32
    %249 = vector.broadcast %cst_70 : f32 to vector<8x1xf32>
    %250 = arith.addf %246, %249 : vector<8x1xf32>
    %251 = math.sqrt %250 : vector<8x1xf32>
    %252 = vector.broadcast %251 : vector<8x1xf32> to vector<8x32xf32>
    %253 = arith.divf %248, %252 : vector<8x32xf32>
    %254 = vector.shape_cast %23 : vector<32xf32> to vector<1x32xf32>
    %255 = vector.broadcast %254 : vector<1x32xf32> to vector<8x32xf32>
    %256 = arith.mulf %255, %253 : vector<8x32xf32>
    %257 = vector.shape_cast %25 : vector<32xf32> to vector<1x32xf32>
    %258 = vector.broadcast %257 : vector<1x32xf32> to vector<8x32xf32>
    %259 = arith.addf %256, %258 : vector<8x32xf32>
    %260 = vector.extract_strided_slice %0 {offsets = [8, 0], sizes = [8, 32], strides = [1, 1]} : vector<16x32xf32> to vector<8x32xf32>
    %c1_71 = arith.constant 1 : index
    %c0_72 = arith.constant 0 : index
    %c0_73 = arith.constant 0 : index
    %261 = vector.load %arg1[%c1_71, %c0_72, %c0_73] : memref<2x8x8xf32, #tpu.memory_space<vmem>>, vector<1x8x8xf32>
    %262 = vector.shape_cast %261 : vector<1x8x8xf32> to vector<8x8xf32>
    %263 = vector.extract_strided_slice %11 {offsets = [8, 0], sizes = [8, 4], strides = [1, 1]} : vector<16x4xf32> to vector<8x4xf32>
    %264 = vector.extract_strided_slice %12 {offsets = [8, 0], sizes = [8, 4], strides = [1, 1]} : vector<16x4xf32> to vector<8x4xf32>
    %265 = vector.extract_strided_slice %13 {offsets = [8, 0], sizes = [8, 4], strides = [1, 1]} : vector<16x4xf32> to vector<8x4xf32>
    %266 = tpu.transpose %265, [1, 0] : vector<8x4xf32> -> vector<4x8xf32>
    %267 = vector.extract_strided_slice %14 {offsets = [8, 0], sizes = [8, 4], strides = [1, 1]} : vector<16x4xf32> to vector<8x4xf32>
    %268 = tpu.transpose %267, [1, 0] : vector<8x4xf32> -> vector<4x8xf32>
    %cst_74 = arith.constant 0.000000e+00 : f32
    %269 = vector.broadcast %cst_74 : f32 to vector<8x32xf32>
    %270 = vector.extract_strided_slice %8 {offsets = [8, 0], sizes = [8, 8], strides = [1, 1]} : vector<16x32xf32> to vector<8x8xf32>
    %271 = vector.extract_strided_slice %9 {offsets = [8, 0], sizes = [8, 8], strides = [1, 1]} : vector<16x32xf32> to vector<8x8xf32>
    %272 = vector.extract_strided_slice %10 {offsets = [8, 0], sizes = [8, 8], strides = [1, 1]} : vector<16x32xf32> to vector<8x8xf32>
    %cst_75 = arith.constant dense<0.000000e+00> : vector<8x8xf32>
    %273 = tpu.matmul %270, %271, %cst_75 {dimension_numbers = #tpu.dot_dimension_numbers<[1], [1], [0], [0], [0, 0, 1, 0], [], []>} : vector<8x8xf32>, vector<8x8xf32>, vector<8x8xf32> -> vector<8x8xf32>
    %274 = vector.extract_strided_slice %263 {offsets = [0, 0], sizes = [8, 1], strides = [1, 1]} : vector<8x4xf32> to vector<8x1xf32>
    %275 = vector.extract_strided_slice %266 {offsets = [0, 0], sizes = [1, 8], strides = [1, 1]} : vector<4x8xf32> to vector<1x8xf32>
    %276 = vector.broadcast %274 : vector<8x1xf32> to vector<8x8xf32>
    %277 = vector.broadcast %275 : vector<1x8xf32> to vector<8x8xf32>
    %278 = arith.addf %276, %277 : vector<8x8xf32>
    %279 = arith.negf %278 : vector<8x8xf32>
    %280 = math.exp %279 : vector<8x8xf32>
    %cst_76 = arith.constant 1.000000e+00 : f32
    %281 = vector.broadcast %cst_76 : f32 to vector<8x8xf32>
    %282 = arith.addf %281, %280 : vector<8x8xf32>
    %283 = arith.divf %281, %282 : vector<8x8xf32>
    %cst_77 = arith.constant 0.000000e+00 : f32
    %284 = vector.broadcast %cst_77 : f32 to vector<8x8xf32>
    %285 = arith.cmpf ogt, %16, %284 : vector<8x8xf32>
    %cst_78 = arith.constant 1.000000e+00 : f32
    %286 = vector.broadcast %cst_78 : f32 to vector<8x8xf32>
    %287 = arith.subf %286, %283 : vector<8x8xf32>
    %288 = arith.select %285, %283, %287 : vector<8x8xi1>, vector<8x8xf32>
    %cst_79 = arith.constant 1.000000e-24 : f32
    %289 = vector.broadcast %cst_79 : f32 to vector<8x8xf32>
    %290 = arith.addf %288, %289 : vector<8x8xf32>
    %291 = math.log %290 : vector<8x8xf32>
    %292 = vector.extract_strided_slice %264 {offsets = [0, 0], sizes = [8, 1], strides = [1, 1]} : vector<8x4xf32> to vector<8x1xf32>
    %293 = vector.extract_strided_slice %268 {offsets = [0, 0], sizes = [1, 8], strides = [1, 1]} : vector<4x8xf32> to vector<1x8xf32>
    %294 = vector.broadcast %292 : vector<8x1xf32> to vector<8x8xf32>
    %295 = vector.broadcast %293 : vector<1x8xf32> to vector<8x8xf32>
    %296 = arith.addf %294, %295 : vector<8x8xf32>
    %297 = arith.subf %18, %296 : vector<8x8xf32>
    %298 = arith.mulf %297, %297 : vector<8x8xf32>
    %cst_80 = arith.constant 0.000000e+00 : f32
    %299 = vector.broadcast %cst_80 : f32 to vector<8x8xf32>
    %300 = arith.subf %299, %298 : vector<8x8xf32>
    %301 = arith.addf %273, %291 : vector<8x8xf32>
    %302 = arith.addf %301, %300 : vector<8x8xf32>
    %cst_81 = arith.constant 0.353553385 : f32
    %303 = vector.broadcast %cst_81 : f32 to vector<8x8xf32>
    %304 = arith.mulf %302, %303 : vector<8x8xf32>
    %305 = arith.addf %304, %262 : vector<8x8xf32>
    %cst_82 = arith.constant dense<0xFF800000> : vector<8xf32>
    %306 = vector.multi_reduction <maximumf>, %305, %cst_82 [1] : vector<8x8xf32> to vector<8xf32>
    %307 = vector.shape_cast %306 : vector<8xf32> to vector<8x1xf32>
    %308 = vector.broadcast %307 : vector<8x1xf32> to vector<8x8xf32>
    %309 = arith.subf %305, %308 : vector<8x8xf32>
    %310 = math.exp %309 : vector<8x8xf32>
    %cst_83 = arith.constant dense<0.000000e+00> : vector<8xf32>
    %311 = vector.multi_reduction <add>, %310, %cst_83 [1] : vector<8x8xf32> to vector<8xf32>
    %312 = vector.shape_cast %311 : vector<8xf32> to vector<8x1xf32>
    %313 = vector.broadcast %312 : vector<8x1xf32> to vector<8x8xf32>
    %314 = arith.divf %310, %313 : vector<8x8xf32>
    %cst_84 = arith.constant dense<0.000000e+00> : vector<8x8xf32>
    %315 = tpu.matmul %314, %272, %cst_84 {dimension_numbers = #tpu.dot_dimension_numbers<[1], [0], [0], [1], [0, 0, 1, 1], [], []>} : vector<8x8xf32>, vector<8x8xf32>, vector<8x8xf32> -> vector<8x8xf32>
    %316 = vector.extract_strided_slice %19 {offsets = [0, 0], sizes = [8, 32], strides = [1, 1]} : vector<32x32xf32> to vector<8x32xf32>
    %cst_85 = arith.constant dense<0.000000e+00> : vector<8x32xf32>
    %317 = tpu.matmul %315, %316, %cst_85 {dimension_numbers = #tpu.dot_dimension_numbers<[1], [0], [0], [1], [0, 0, 1, 1], [], []>} : vector<8x8xf32>, vector<8x32xf32>, vector<8x32xf32> -> vector<8x32xf32>
    %318 = arith.addf %269, %317 : vector<8x32xf32>
    %319 = vector.extract_strided_slice %8 {offsets = [8, 8], sizes = [8, 8], strides = [1, 1]} : vector<16x32xf32> to vector<8x8xf32>
    %320 = vector.extract_strided_slice %9 {offsets = [8, 8], sizes = [8, 8], strides = [1, 1]} : vector<16x32xf32> to vector<8x8xf32>
    %321 = vector.extract_strided_slice %10 {offsets = [8, 8], sizes = [8, 8], strides = [1, 1]} : vector<16x32xf32> to vector<8x8xf32>
    %cst_86 = arith.constant dense<0.000000e+00> : vector<8x8xf32>
    %322 = tpu.matmul %319, %320, %cst_86 {dimension_numbers = #tpu.dot_dimension_numbers<[1], [1], [0], [0], [0, 0, 1, 0], [], []>} : vector<8x8xf32>, vector<8x8xf32>, vector<8x8xf32> -> vector<8x8xf32>
    %323 = vector.extract_strided_slice %263 {offsets = [0, 1], sizes = [8, 1], strides = [1, 1]} : vector<8x4xf32> to vector<8x1xf32>
    %324 = vector.extract_strided_slice %266 {offsets = [1, 0], sizes = [1, 8], strides = [1, 1]} : vector<4x8xf32> to vector<1x8xf32>
    %325 = vector.broadcast %323 : vector<8x1xf32> to vector<8x8xf32>
    %326 = vector.broadcast %324 : vector<1x8xf32> to vector<8x8xf32>
    %327 = arith.addf %325, %326 : vector<8x8xf32>
    %328 = arith.negf %327 : vector<8x8xf32>
    %329 = math.exp %328 : vector<8x8xf32>
    %cst_87 = arith.constant 1.000000e+00 : f32
    %330 = vector.broadcast %cst_87 : f32 to vector<8x8xf32>
    %331 = arith.addf %330, %329 : vector<8x8xf32>
    %332 = arith.divf %330, %331 : vector<8x8xf32>
    %cst_88 = arith.constant 0.000000e+00 : f32
    %333 = vector.broadcast %cst_88 : f32 to vector<8x8xf32>
    %334 = arith.cmpf ogt, %16, %333 : vector<8x8xf32>
    %cst_89 = arith.constant 1.000000e+00 : f32
    %335 = vector.broadcast %cst_89 : f32 to vector<8x8xf32>
    %336 = arith.subf %335, %332 : vector<8x8xf32>
    %337 = arith.select %334, %332, %336 : vector<8x8xi1>, vector<8x8xf32>
    %cst_90 = arith.constant 1.000000e-24 : f32
    %338 = vector.broadcast %cst_90 : f32 to vector<8x8xf32>
    %339 = arith.addf %337, %338 : vector<8x8xf32>
    %340 = math.log %339 : vector<8x8xf32>
    %341 = vector.extract_strided_slice %264 {offsets = [0, 1], sizes = [8, 1], strides = [1, 1]} : vector<8x4xf32> to vector<8x1xf32>
    %342 = vector.extract_strided_slice %268 {offsets = [1, 0], sizes = [1, 8], strides = [1, 1]} : vector<4x8xf32> to vector<1x8xf32>
    %343 = vector.broadcast %341 : vector<8x1xf32> to vector<8x8xf32>
    %344 = vector.broadcast %342 : vector<1x8xf32> to vector<8x8xf32>
    %345 = arith.addf %343, %344 : vector<8x8xf32>
    %346 = arith.subf %18, %345 : vector<8x8xf32>
    %347 = arith.mulf %346, %346 : vector<8x8xf32>
    %cst_91 = arith.constant 0.000000e+00 : f32
    %348 = vector.broadcast %cst_91 : f32 to vector<8x8xf32>
    %349 = arith.subf %348, %347 : vector<8x8xf32>
    %350 = arith.addf %322, %340 : vector<8x8xf32>
    %351 = arith.addf %350, %349 : vector<8x8xf32>
    %cst_92 = arith.constant 0.353553385 : f32
    %352 = vector.broadcast %cst_92 : f32 to vector<8x8xf32>
    %353 = arith.mulf %351, %352 : vector<8x8xf32>
    %354 = arith.addf %353, %262 : vector<8x8xf32>
    %cst_93 = arith.constant dense<0xFF800000> : vector<8xf32>
    %355 = vector.multi_reduction <maximumf>, %354, %cst_93 [1] : vector<8x8xf32> to vector<8xf32>
    %356 = vector.shape_cast %355 : vector<8xf32> to vector<8x1xf32>
    %357 = vector.broadcast %356 : vector<8x1xf32> to vector<8x8xf32>
    %358 = arith.subf %354, %357 : vector<8x8xf32>
    %359 = math.exp %358 : vector<8x8xf32>
    %cst_94 = arith.constant dense<0.000000e+00> : vector<8xf32>
    %360 = vector.multi_reduction <add>, %359, %cst_94 [1] : vector<8x8xf32> to vector<8xf32>
    %361 = vector.shape_cast %360 : vector<8xf32> to vector<8x1xf32>
    %362 = vector.broadcast %361 : vector<8x1xf32> to vector<8x8xf32>
    %363 = arith.divf %359, %362 : vector<8x8xf32>
    %cst_95 = arith.constant dense<0.000000e+00> : vector<8x8xf32>
    %364 = tpu.matmul %363, %321, %cst_95 {dimension_numbers = #tpu.dot_dimension_numbers<[1], [0], [0], [1], [0, 0, 1, 1], [], []>} : vector<8x8xf32>, vector<8x8xf32>, vector<8x8xf32> -> vector<8x8xf32>
    %365 = vector.extract_strided_slice %19 {offsets = [8, 0], sizes = [8, 32], strides = [1, 1]} : vector<32x32xf32> to vector<8x32xf32>
    %cst_96 = arith.constant dense<0.000000e+00> : vector<8x32xf32>
    %366 = tpu.matmul %364, %365, %cst_96 {dimension_numbers = #tpu.dot_dimension_numbers<[1], [0], [0], [1], [0, 0, 1, 1], [], []>} : vector<8x8xf32>, vector<8x32xf32>, vector<8x32xf32> -> vector<8x32xf32>
    %367 = arith.addf %318, %366 : vector<8x32xf32>
    %368 = vector.extract_strided_slice %8 {offsets = [8, 16], sizes = [8, 8], strides = [1, 1]} : vector<16x32xf32> to vector<8x8xf32>
    %369 = vector.extract_strided_slice %9 {offsets = [8, 16], sizes = [8, 8], strides = [1, 1]} : vector<16x32xf32> to vector<8x8xf32>
    %370 = vector.extract_strided_slice %10 {offsets = [8, 16], sizes = [8, 8], strides = [1, 1]} : vector<16x32xf32> to vector<8x8xf32>
    %cst_97 = arith.constant dense<0.000000e+00> : vector<8x8xf32>
    %371 = tpu.matmul %368, %369, %cst_97 {dimension_numbers = #tpu.dot_dimension_numbers<[1], [1], [0], [0], [0, 0, 1, 0], [], []>} : vector<8x8xf32>, vector<8x8xf32>, vector<8x8xf32> -> vector<8x8xf32>
    %372 = vector.extract_strided_slice %263 {offsets = [0, 2], sizes = [8, 1], strides = [1, 1]} : vector<8x4xf32> to vector<8x1xf32>
    %373 = vector.extract_strided_slice %266 {offsets = [2, 0], sizes = [1, 8], strides = [1, 1]} : vector<4x8xf32> to vector<1x8xf32>
    %374 = vector.broadcast %372 : vector<8x1xf32> to vector<8x8xf32>
    %375 = vector.broadcast %373 : vector<1x8xf32> to vector<8x8xf32>
    %376 = arith.addf %374, %375 : vector<8x8xf32>
    %377 = arith.negf %376 : vector<8x8xf32>
    %378 = math.exp %377 : vector<8x8xf32>
    %cst_98 = arith.constant 1.000000e+00 : f32
    %379 = vector.broadcast %cst_98 : f32 to vector<8x8xf32>
    %380 = arith.addf %379, %378 : vector<8x8xf32>
    %381 = arith.divf %379, %380 : vector<8x8xf32>
    %cst_99 = arith.constant 0.000000e+00 : f32
    %382 = vector.broadcast %cst_99 : f32 to vector<8x8xf32>
    %383 = arith.cmpf ogt, %16, %382 : vector<8x8xf32>
    %cst_100 = arith.constant 1.000000e+00 : f32
    %384 = vector.broadcast %cst_100 : f32 to vector<8x8xf32>
    %385 = arith.subf %384, %381 : vector<8x8xf32>
    %386 = arith.select %383, %381, %385 : vector<8x8xi1>, vector<8x8xf32>
    %cst_101 = arith.constant 1.000000e-24 : f32
    %387 = vector.broadcast %cst_101 : f32 to vector<8x8xf32>
    %388 = arith.addf %386, %387 : vector<8x8xf32>
    %389 = math.log %388 : vector<8x8xf32>
    %390 = vector.extract_strided_slice %264 {offsets = [0, 2], sizes = [8, 1], strides = [1, 1]} : vector<8x4xf32> to vector<8x1xf32>
    %391 = vector.extract_strided_slice %268 {offsets = [2, 0], sizes = [1, 8], strides = [1, 1]} : vector<4x8xf32> to vector<1x8xf32>
    %392 = vector.broadcast %390 : vector<8x1xf32> to vector<8x8xf32>
    %393 = vector.broadcast %391 : vector<1x8xf32> to vector<8x8xf32>
    %394 = arith.addf %392, %393 : vector<8x8xf32>
    %395 = arith.subf %18, %394 : vector<8x8xf32>
    %396 = arith.mulf %395, %395 : vector<8x8xf32>
    %cst_102 = arith.constant 0.000000e+00 : f32
    %397 = vector.broadcast %cst_102 : f32 to vector<8x8xf32>
    %398 = arith.subf %397, %396 : vector<8x8xf32>
    %399 = arith.addf %371, %389 : vector<8x8xf32>
    %400 = arith.addf %399, %398 : vector<8x8xf32>
    %cst_103 = arith.constant 0.353553385 : f32
    %401 = vector.broadcast %cst_103 : f32 to vector<8x8xf32>
    %402 = arith.mulf %400, %401 : vector<8x8xf32>
    %403 = arith.addf %402, %262 : vector<8x8xf32>
    %cst_104 = arith.constant dense<0xFF800000> : vector<8xf32>
    %404 = vector.multi_reduction <maximumf>, %403, %cst_104 [1] : vector<8x8xf32> to vector<8xf32>
    %405 = vector.shape_cast %404 : vector<8xf32> to vector<8x1xf32>
    %406 = vector.broadcast %405 : vector<8x1xf32> to vector<8x8xf32>
    %407 = arith.subf %403, %406 : vector<8x8xf32>
    %408 = math.exp %407 : vector<8x8xf32>
    %cst_105 = arith.constant dense<0.000000e+00> : vector<8xf32>
    %409 = vector.multi_reduction <add>, %408, %cst_105 [1] : vector<8x8xf32> to vector<8xf32>
    %410 = vector.shape_cast %409 : vector<8xf32> to vector<8x1xf32>
    %411 = vector.broadcast %410 : vector<8x1xf32> to vector<8x8xf32>
    %412 = arith.divf %408, %411 : vector<8x8xf32>
    %cst_106 = arith.constant dense<0.000000e+00> : vector<8x8xf32>
    %413 = tpu.matmul %412, %370, %cst_106 {dimension_numbers = #tpu.dot_dimension_numbers<[1], [0], [0], [1], [0, 0, 1, 1], [], []>} : vector<8x8xf32>, vector<8x8xf32>, vector<8x8xf32> -> vector<8x8xf32>
    %414 = vector.extract_strided_slice %19 {offsets = [16, 0], sizes = [8, 32], strides = [1, 1]} : vector<32x32xf32> to vector<8x32xf32>
    %cst_107 = arith.constant dense<0.000000e+00> : vector<8x32xf32>
    %415 = tpu.matmul %413, %414, %cst_107 {dimension_numbers = #tpu.dot_dimension_numbers<[1], [0], [0], [1], [0, 0, 1, 1], [], []>} : vector<8x8xf32>, vector<8x32xf32>, vector<8x32xf32> -> vector<8x32xf32>
    %416 = arith.addf %367, %415 : vector<8x32xf32>
    %417 = vector.extract_strided_slice %8 {offsets = [8, 24], sizes = [8, 8], strides = [1, 1]} : vector<16x32xf32> to vector<8x8xf32>
    %418 = vector.extract_strided_slice %9 {offsets = [8, 24], sizes = [8, 8], strides = [1, 1]} : vector<16x32xf32> to vector<8x8xf32>
    %419 = vector.extract_strided_slice %10 {offsets = [8, 24], sizes = [8, 8], strides = [1, 1]} : vector<16x32xf32> to vector<8x8xf32>
    %cst_108 = arith.constant dense<0.000000e+00> : vector<8x8xf32>
    %420 = tpu.matmul %417, %418, %cst_108 {dimension_numbers = #tpu.dot_dimension_numbers<[1], [1], [0], [0], [0, 0, 1, 0], [], []>} : vector<8x8xf32>, vector<8x8xf32>, vector<8x8xf32> -> vector<8x8xf32>
    %421 = vector.extract_strided_slice %263 {offsets = [0, 3], sizes = [8, 1], strides = [1, 1]} : vector<8x4xf32> to vector<8x1xf32>
    %422 = vector.extract_strided_slice %266 {offsets = [3, 0], sizes = [1, 8], strides = [1, 1]} : vector<4x8xf32> to vector<1x8xf32>
    %423 = vector.broadcast %421 : vector<8x1xf32> to vector<8x8xf32>
    %424 = vector.broadcast %422 : vector<1x8xf32> to vector<8x8xf32>
    %425 = arith.addf %423, %424 : vector<8x8xf32>
    %426 = arith.negf %425 : vector<8x8xf32>
    %427 = math.exp %426 : vector<8x8xf32>
    %cst_109 = arith.constant 1.000000e+00 : f32
    %428 = vector.broadcast %cst_109 : f32 to vector<8x8xf32>
    %429 = arith.addf %428, %427 : vector<8x8xf32>
    %430 = arith.divf %428, %429 : vector<8x8xf32>
    %cst_110 = arith.constant 0.000000e+00 : f32
    %431 = vector.broadcast %cst_110 : f32 to vector<8x8xf32>
    %432 = arith.cmpf ogt, %16, %431 : vector<8x8xf32>
    %cst_111 = arith.constant 1.000000e+00 : f32
    %433 = vector.broadcast %cst_111 : f32 to vector<8x8xf32>
    %434 = arith.subf %433, %430 : vector<8x8xf32>
    %435 = arith.select %432, %430, %434 : vector<8x8xi1>, vector<8x8xf32>
    %cst_112 = arith.constant 1.000000e-24 : f32
    %436 = vector.broadcast %cst_112 : f32 to vector<8x8xf32>
    %437 = arith.addf %435, %436 : vector<8x8xf32>
    %438 = math.log %437 : vector<8x8xf32>
    %439 = vector.extract_strided_slice %264 {offsets = [0, 3], sizes = [8, 1], strides = [1, 1]} : vector<8x4xf32> to vector<8x1xf32>
    %440 = vector.extract_strided_slice %268 {offsets = [3, 0], sizes = [1, 8], strides = [1, 1]} : vector<4x8xf32> to vector<1x8xf32>
    %441 = vector.broadcast %439 : vector<8x1xf32> to vector<8x8xf32>
    %442 = vector.broadcast %440 : vector<1x8xf32> to vector<8x8xf32>
    %443 = arith.addf %441, %442 : vector<8x8xf32>
    %444 = arith.subf %18, %443 : vector<8x8xf32>
    %445 = arith.mulf %444, %444 : vector<8x8xf32>
    %cst_113 = arith.constant 0.000000e+00 : f32
    %446 = vector.broadcast %cst_113 : f32 to vector<8x8xf32>
    %447 = arith.subf %446, %445 : vector<8x8xf32>
    %448 = arith.addf %420, %438 : vector<8x8xf32>
    %449 = arith.addf %448, %447 : vector<8x8xf32>
    %cst_114 = arith.constant 0.353553385 : f32
    %450 = vector.broadcast %cst_114 : f32 to vector<8x8xf32>
    %451 = arith.mulf %449, %450 : vector<8x8xf32>
    %452 = arith.addf %451, %262 : vector<8x8xf32>
    %cst_115 = arith.constant dense<0xFF800000> : vector<8xf32>
    %453 = vector.multi_reduction <maximumf>, %452, %cst_115 [1] : vector<8x8xf32> to vector<8xf32>
    %454 = vector.shape_cast %453 : vector<8xf32> to vector<8x1xf32>
    %455 = vector.broadcast %454 : vector<8x1xf32> to vector<8x8xf32>
    %456 = arith.subf %452, %455 : vector<8x8xf32>
    %457 = math.exp %456 : vector<8x8xf32>
    %cst_116 = arith.constant dense<0.000000e+00> : vector<8xf32>
    %458 = vector.multi_reduction <add>, %457, %cst_116 [1] : vector<8x8xf32> to vector<8xf32>
    %459 = vector.shape_cast %458 : vector<8xf32> to vector<8x1xf32>
    %460 = vector.broadcast %459 : vector<8x1xf32> to vector<8x8xf32>
    %461 = arith.divf %457, %460 : vector<8x8xf32>
    %cst_117 = arith.constant dense<0.000000e+00> : vector<8x8xf32>
    %462 = tpu.matmul %461, %419, %cst_117 {dimension_numbers = #tpu.dot_dimension_numbers<[1], [0], [0], [1], [0, 0, 1, 1], [], []>} : vector<8x8xf32>, vector<8x8xf32>, vector<8x8xf32> -> vector<8x8xf32>
    %463 = vector.extract_strided_slice %19 {offsets = [24, 0], sizes = [8, 32], strides = [1, 1]} : vector<32x32xf32> to vector<8x32xf32>
    %cst_118 = arith.constant dense<0.000000e+00> : vector<8x32xf32>
    %464 = tpu.matmul %462, %463, %cst_118 {dimension_numbers = #tpu.dot_dimension_numbers<[1], [0], [0], [1], [0, 0, 1, 1], [], []>} : vector<8x8xf32>, vector<8x32xf32>, vector<8x32xf32> -> vector<8x32xf32>
    %465 = arith.addf %416, %464 : vector<8x32xf32>
    %466 = vector.shape_cast %21 : vector<32xf32> to vector<1x32xf32>
    %467 = vector.broadcast %466 : vector<1x32xf32> to vector<8x32xf32>
    %468 = arith.addf %465, %467 : vector<8x32xf32>
    %469 = arith.addf %468, %260 : vector<8x32xf32>
    %cst_119 = arith.constant dense<0.000000e+00> : vector<8xf32>
    %470 = vector.multi_reduction <add>, %469, %cst_119 [1] : vector<8x32xf32> to vector<8xf32>
    %471 = vector.shape_cast %470 : vector<8xf32> to vector<8x1xf32>
    %cst_120 = arith.constant 3.200000e+01 : f32
    %472 = vector.broadcast %cst_120 : f32 to vector<8x1xf32>
    %473 = arith.divf %471, %472 : vector<8x1xf32>
    %474 = vector.broadcast %473 : vector<8x1xf32> to vector<8x32xf32>
    %475 = arith.subf %469, %474 : vector<8x32xf32>
    %476 = arith.mulf %475, %475 : vector<8x32xf32>
    %cst_121 = arith.constant dense<0.000000e+00> : vector<8xf32>
    %477 = vector.multi_reduction <add>, %476, %cst_121 [1] : vector<8x32xf32> to vector<8xf32>
    %478 = vector.shape_cast %477 : vector<8xf32> to vector<8x1xf32>
    %cst_122 = arith.constant 3.200000e+01 : f32
    %479 = vector.broadcast %cst_122 : f32 to vector<8x1xf32>
    %480 = arith.divf %478, %479 : vector<8x1xf32>
    %481 = vector.broadcast %473 : vector<8x1xf32> to vector<8x32xf32>
    %482 = arith.subf %469, %481 : vector<8x32xf32>
    %cst_123 = arith.constant 9.99999996E-13 : f32
    %483 = vector.broadcast %cst_123 : f32 to vector<8x1xf32>
    %484 = arith.addf %480, %483 : vector<8x1xf32>
    %485 = math.sqrt %484 : vector<8x1xf32>
    %486 = vector.broadcast %485 : vector<8x1xf32> to vector<8x32xf32>
    %487 = arith.divf %482, %486 : vector<8x32xf32>
    %488 = vector.shape_cast %23 : vector<32xf32> to vector<1x32xf32>
    %489 = vector.broadcast %488 : vector<1x32xf32> to vector<8x32xf32>
    %490 = arith.mulf %489, %487 : vector<8x32xf32>
    %491 = vector.shape_cast %25 : vector<32xf32> to vector<1x32xf32>
    %492 = vector.broadcast %491 : vector<1x32xf32> to vector<8x32xf32>
    %493 = arith.addf %490, %492 : vector<8x32xf32>
    %494 = tpu.concatenate %259, %493 in 0 : vector<8x32xf32>, vector<8x32xf32> -> vector<16x32xf32>
    %c0_124 = arith.constant 0 : index
    %c0_125 = arith.constant 0 : index
    %495 = vector.load %arg9[%c0_124, %c0_125] : memref<32x64xf32, #tpu.memory_space<vmem>>, vector<32x64xf32>
    %cst_126 = arith.constant dense<0.000000e+00> : vector<16x64xf32>
    %496 = tpu.matmul %494, %495, %cst_126 {dimension_numbers = #tpu.dot_dimension_numbers<[1], [0], [0], [1], [0, 0, 1, 1], [], []>} : vector<16x32xf32>, vector<32x64xf32>, vector<16x64xf32> -> vector<16x64xf32>
    %c0_127 = arith.constant 0 : index
    %c0_128 = arith.constant 0 : index
    %497 = vector.load %arg10[%c0_127, %c0_128] : memref<1x64xf32, #tpu.memory_space<vmem>>, vector<1x64xf32>
    %498 = vector.shape_cast %497 : vector<1x64xf32> to vector<64xf32>
    %499 = vector.shape_cast %498 : vector<64xf32> to vector<1x64xf32>
    %500 = vector.broadcast %499 : vector<1x64xf32> to vector<16x64xf32>
    %501 = arith.addf %496, %500 : vector<16x64xf32>
    %cst_129 = arith.constant 5.000000e-01 : f32
    %502 = vector.broadcast %cst_129 : f32 to vector<16x64xf32>
    %503 = arith.mulf %501, %502 : vector<16x64xf32>
    %cst_130 = arith.constant 1.41421354 : f32
    %504 = vector.broadcast %cst_130 : f32 to vector<16x64xf32>
    %505 = arith.divf %501, %504 : vector<16x64xf32>
    %506 = math.erf %505 : vector<16x64xf32>
    %cst_131 = arith.constant 1.000000e+00 : f32
    %507 = vector.broadcast %cst_131 : f32 to vector<16x64xf32>
    %508 = arith.addf %507, %506 : vector<16x64xf32>
    %509 = arith.mulf %503, %508 : vector<16x64xf32>
    %c0_132 = arith.constant 0 : index
    %c0_133 = arith.constant 0 : index
    %510 = vector.load %arg11[%c0_132, %c0_133] : memref<64x32xf32, #tpu.memory_space<vmem>>, vector<64x32xf32>
    %cst_134 = arith.constant dense<0.000000e+00> : vector<16x32xf32>
    %511 = tpu.matmul %509, %510, %cst_134 {dimension_numbers = #tpu.dot_dimension_numbers<[1], [0], [0], [1], [0, 0, 1, 1], [], []>} : vector<16x64xf32>, vector<64x32xf32>, vector<16x32xf32> -> vector<16x32xf32>
    %c0_135 = arith.constant 0 : index
    %c0_136 = arith.constant 0 : index
    %512 = vector.load %arg12[%c0_135, %c0_136] : memref<1x32xf32, #tpu.memory_space<vmem>>, vector<1x32xf32>
    %513 = vector.shape_cast %512 : vector<1x32xf32> to vector<32xf32>
    %514 = vector.shape_cast %513 : vector<32xf32> to vector<1x32xf32>
    %515 = vector.broadcast %514 : vector<1x32xf32> to vector<16x32xf32>
    %516 = arith.addf %511, %515 : vector<16x32xf32>
    %517 = arith.addf %494, %516 : vector<16x32xf32>
    %c0_137 = arith.constant 0 : index
    %c0_138 = arith.constant 0 : index
    %518 = vector.load %arg13[%c0_137, %c0_138] : memref<1x32xf32, #tpu.memory_space<vmem>>, vector<1x32xf32>
    %519 = vector.shape_cast %518 : vector<1x32xf32> to vector<32xf32>
    %c0_139 = arith.constant 0 : index
    %c0_140 = arith.constant 0 : index
    %520 = vector.load %arg14[%c0_139, %c0_140] : memref<1x32xf32, #tpu.memory_space<vmem>>, vector<1x32xf32>
    %521 = vector.shape_cast %520 : vector<1x32xf32> to vector<32xf32>
    %cst_141 = arith.constant dense<0.000000e+00> : vector<16xf32>
    %522 = vector.multi_reduction <add>, %517, %cst_141 [1] : vector<16x32xf32> to vector<16xf32>
    %523 = vector.shape_cast %522 : vector<16xf32> to vector<16x1xf32>
    %cst_142 = arith.constant 3.200000e+01 : f32
    %524 = vector.broadcast %cst_142 : f32 to vector<16x1xf32>
    %525 = arith.divf %523, %524 : vector<16x1xf32>
    %526 = vector.broadcast %525 : vector<16x1xf32> to vector<16x32xf32>
    %527 = arith.subf %517, %526 : vector<16x32xf32>
    %528 = arith.mulf %527, %527 : vector<16x32xf32>
    %cst_143 = arith.constant dense<0.000000e+00> : vector<16xf32>
    %529 = vector.multi_reduction <add>, %528, %cst_143 [1] : vector<16x32xf32> to vector<16xf32>
    %530 = vector.shape_cast %529 : vector<16xf32> to vector<16x1xf32>
    %cst_144 = arith.constant 3.200000e+01 : f32
    %531 = vector.broadcast %cst_144 : f32 to vector<16x1xf32>
    %532 = arith.divf %530, %531 : vector<16x1xf32>
    %533 = vector.broadcast %525 : vector<16x1xf32> to vector<16x32xf32>
    %534 = arith.subf %517, %533 : vector<16x32xf32>
    %cst_145 = arith.constant 9.99999996E-13 : f32
    %535 = vector.broadcast %cst_145 : f32 to vector<16x1xf32>
    %536 = arith.addf %532, %535 : vector<16x1xf32>
    %537 = math.sqrt %536 : vector<16x1xf32>
    %538 = vector.broadcast %537 : vector<16x1xf32> to vector<16x32xf32>
    %539 = arith.divf %534, %538 : vector<16x32xf32>
    %540 = vector.shape_cast %519 : vector<32xf32> to vector<1x32xf32>
    %541 = vector.broadcast %540 : vector<1x32xf32> to vector<16x32xf32>
    %542 = arith.mulf %541, %539 : vector<16x32xf32>
    %543 = vector.shape_cast %521 : vector<32xf32> to vector<1x32xf32>
    %544 = vector.broadcast %543 : vector<1x32xf32> to vector<16x32xf32>
    %545 = arith.addf %542, %544 : vector<16x32xf32>
    %c0_146 = arith.constant 0 : index
    %c0_147 = arith.constant 0 : index
    %546 = vector.load %arg15[%c0_146, %c0_147] : memref<16x32xf32, #tpu.memory_space<vmem>>, vector<16x32xf32>
    tpu.vector_store %arg15[%c0_146, %c0_147], %545 {strides = array<i32>} : memref<16x32xf32, #tpu.memory_space<vmem>>, vector<16x32xf32>,
    return
  }
}

</mosaic_0001>

<bundles_post_ra>
// kernel: run_decoder_layer.1
= control target key start
LH: loop header
LB: loop body
LE: loop exit
PB: predicated region body
PF: predicated region fallthrough
CT: control target
= control target key end

     0   :  { %vm64_vm0 = vcmask 261120   ;;  %s3898_s0 = inlined_call_operand.vmem [shape: f32[16,32], index: 0, kind: input, shape index: {}]   ;;  %s3899_s1 = inlined_call_operand.vmem [shape: f32[2,8,8], index: 1, kind: input, shape index: {}]   ;;  %s3900_s2 = inlined_call_operand.vmem [shape: f32[2,8,8], index: 2, kind: input, shape index: {}]   ;;  %s3901_s3 = inlined_call_operand.vmem [shape: f32[32,112], index: 3, kind: input, shape index: {}]   ;;  %s3902_s4 = inlined_call_operand.vmem [shape: f32[1,112], index: 4, kind: input, shape index: {}]   ;;  %s3903_s5 = inlined_call_operand.vmem [shape: f32[32,32], index: 5, kind: input, shape index: {}]   ;;  %s3904_s6 = inlined_call_operand.vmem [shape: f32[1,32], index: 6, kind: input, shape index: {}]   ;;  %s3905_s7 = inlined_call_operand.vmem [shape: f32[1,32], index: 7, kind: input, shape index: {}]   ;;  %s3906_s8 = inlined_call_operand.vmem [shape: f32[1,32], index: 8, kind: input, shape index: {}]   ;;  %s3907_s9 = inlined_call_operand.vmem [shape: f32[32,64], index: 9, kind: input, shape index: {}]   ;;  %s3908_s10 = inlined_call_operand.vmem [shape: f32[1,64], index: 10, kind: input, shape index: {}]   ;;  %s3909_s11 = inlined_call_operand.vmem [shape: f32[64,32], index: 11, kind: input, shape index: {}]   ;;  %s3910_s12 = inlined_call_operand.vmem [shape: f32[1,32], index: 12, kind: input, shape index: {}]   ;;  %s3911_s13 = inlined_call_operand.vmem [shape: f32[1,32], index: 13, kind: input, shape index: {}]   ;;  %s3912_s14 = inlined_call_operand.vmem [shape: f32[1,32], index: 14, kind: input, shape index: {}]   ;;  %s3913_s15 = inlined_call_operand.hbm [shape: f32[16,32], index: 15, kind: output, shape index: {}]  }
   0x1   :  { %v53_v0 = vld [vmem:[%s3901_s3] sm:$0xff]  ;;  %v54_v1 = vld [vmem:[%s3901_s3 + $0x8] sm:$0xff]  ;;  %v55_v2 = vld [vmem:[%s3901_s3 + $0x10] sm:$0xff] }
   0x2   :  { %v3119_v3 = vpack.c.bf16 %v54_v1, %v53_v0  ;;  %v56_v4 = vld [vmem:[%s3901_s3 + $0x18] sm:$0xff]  ;;  %v51_v5 = vld [vmem:[%s3898_s0] sm:$0xff] }
   0x3   :  { %v3123_v6 = vpack.c.bf16 %v56_v4, %v55_v2  ;;  %2966 = vmatprep.mubr.msk.f32.mxu0 %vm64_vm0, %v51_v5 }
   0x4   :  { %20 = vsyncpa [#allocation3], 0  ;;  %3120 = vmatprep.subr.bf16.mxu0 %v3119_v3  ;;  %v52_v7 = vld [vmem:[%s3898_s0 + $0x8] sm:$0xff]  ;;  %v3320_v8 = vmov 97   ;;  %v3321_v9 = vmov 96   ;;  %v3322_v10 = vmov 0.0   ;;  %v232_v25 = vlaneseq }
   0x5   :  { %3122 = vmatpush3.bf16.msra.mxu0 %v3119_v3  ;;  %3178 = vset.pattern.permute.xlu1 %v3320_v8  ;;  %vm3323_vm1 = vmmov 0   ;;  %v2832_v11 = vld [vmem:[%s3902_s4] ss:$0 sm:$0xff]  ;;  %s3324_s16 = smov 120   ;;  %s3325_s17 = smov 96   ;;  %v3329_v16 = vmov 100  }
   0x6   :  { %3124 = vmatprep.subr.bf16.mxu0 %v3123_v6  ;;  %3177 = vset.pattern.permute.xlu0 %v3321_v9  ;;  %s3326_s18 = smov 24   ;;  %s3327_s19 = smov 88   ;;  %v3330_v17 = vmov 101   ;;  %vm263_vm2 = vcmask 64512   ;;  %v3331_v24 = vmov 102   ;;  %v3489_v26 = vshrl.u32 %v232_v25, 7 }
   0x7   :  { %2974 = vmatprep.subr.mxu1 %v3322_v10  ;;  %2976 = vmatprep.mubr.msk.f32.mxu1 %vm3323_vm1, %v3322_v10  ;;  %s3328_s4 = smov 20   ;;  %v3506_v43 = vld [vmem:[%s3900_s2] sm:$0xff]  ;;  %v3522_v56 = vld [vmem:[%s3900_s2 + $0x8] sm:$0xff]  ;;  %s3332_s25 = smov 56   ;;  %vm2672_vm8 = vcmask 523264  }
   0x8   :  { %v3492_v28 = vsub.s32 0, %v3489_v26  ;;  %v3497_v30 = vsub.s32 1, %v3489_v26  ;;  %vm243_vm3 = vcmp.gt.f32.partialorder %v3506_v43, 0.0  ;;  %s3333_s26 = smov 112   ;;  %s3335_s27 = smov 64  }
   0x9   :  { %3126 = vmatpush3.bf16.msra.mxu0 %v3123_v6  ;;  %s3336_s28 = smov 80   ;;  %s3338_s21 = smov 72  }
   0xa   :  { %2969 = vmatprep.subr.mxu0 %v3322_v10  ;;  %s3339_s22 = smov 104   ;;  %s3341_s23 = smov 48  }
   0xc   :  { %2967 = vmatmul.mubr.msk.f32.vlgmr.msra.gmra.mrb[0].mxu0 %vm64_vm0, %v52_v7 }
   0xd   :  { %2971 = vmatprep.mubr.msk.f32.mxu0 %vm3323_vm1, %v3322_v10 }
  0xdf   :  { %v2968_v12 = vpop.f32.mrb[0].mxu0 }
  0xe0   :  { %v3457_v13 = vadd.f32 %v2968_v12, %v2832_v11  ;;  %v137_v14 = vpop.f32.mrb[1].mxu0 }
  0xe1   :  { %v3459_v15 = vadd.f32 %v2832_v11, %v137_v14  ;;  %v3529_v11 = vld [vmem:[%s3899_s1] sm:$0xff] }
  0xe3   :  { %460 = vrot.lane.b32.xlu1 %v3459_v15, %s3324_s16  ;;  %261 = vrot.lane.b32.xlu0 %v3459_v15, %s3325_s17 }
  0xe7   :  { %158 = vrot.lane.b32.xlu1 %v3459_v15, %s3326_s18  ;;  %462 = vrot.lane.b32.xlu0 %v3459_v15, %s3327_s19 }
  0xeb   :  { %429 = vperm.xlu1 %3178, %v3459_v15   ;;  %229 = vperm.xlu0 %3177, %v3459_v15  }
  0xef   :  { %193 = vrot.lane.b32.xlu1 %v3459_v15, %s3328_s4 }
  0xf0   :  { %3179 = vset.pattern.permute.xlu1 %v3329_v16 }
  0xf3   :  { %250 = vperm.xlu1 %3179, %v3459_v15  }
  0xf7   :  { %3180 = vset.pattern.permute.xlu1 %v3330_v17 }
  0xf8   :  { %449 = vperm.xlu1 %3180, %v3459_v15  }
 0x155   :  { %v461_v18 = vpop.permute.xlu1 %460  ;;  %v262_v19 = vpop.permute.xlu0 %261 }
 0x156   :  { %2970 = vmatpush3.xpose.msk.msra.mxu0 %vm263_vm2, %v262_v19 }
 0x157   :  { %2979 = vmatprep.subr.mxu0 %v3322_v10 }
 0x159   :  { %v159_v20 = vpop.permute.xlu1 %158  ;;  %2972 = vmatmul.mubr.msk.f32.vlgmr.msra.gmra.mrb[2].mxu0 %vm263_vm2, %v3459_v15  ;;  %v463_v21 = vpop.permute.xlu0 %462 }
 0x15a   :  { %161 = vxpose.xlu0.b32.start.end [1/1] (short) (narrow) %v159_v20, 8  ;;  %2980 = vmatpush3.xpose.msk.msra.mxu0 %vm263_vm2, %v463_v21 }
 0x15b   :  { %2981 = vmatprep.mubr.msk.f32.mxu0 %vm3323_vm1, %v3322_v10  ;;  %2989 = vmatprep.subr.mxu0 %v3322_v10 }
 0x15d   :  { %2982 = vmatmul.mubr.msk.f32.vlgmr.msra.gmra.mrb[4].mxu0 %vm263_vm2, %v461_v18 }
 0x15e   :  { %2991 = vmatprep.mubr.msk.f32.mxu0 %vm3323_vm1, %v3322_v10 }
 0x16a   :  { %v430_v22 = vpop.permute.xlu1 %429  ;;  %v230_v27 = vpop.permute.xlu0 %229 }
 0x16e   :  { %v194_v23 = vpop.permute.xlu1 %193 }
 0x16f   :  { %196 = vxpose.xlu1.b32.start.end [1/1] (short) (narrow) %v194_v23, 8 }
 0x172   :  { %v251_v42 = vpop.permute.xlu1 %250 }
 0x177   :  { %v450_v46 = vpop.permute.xlu1 %449 }
 0x18d   :  { %3182 = vset.pattern.permute.xlu1 %v3331_v24 }
 0x1da   :  { %v3494_v29 = vpop.trf.xlu0 }
 0x1db   :  { %v235_v31 = vrot.slane %v3494_v29, %v3492_v28  ;;  %v435_v33 = vrot.slane %v3494_v29, %v3497_v30 }
 0x1dd   :  { %v236_v32 = vadd.f32 %v235_v31, %v230_v27  ;;  %v436_v35 = vadd.f32 %v435_v33, %v430_v22  ;;  %v3334_v31 = vmov 98  }
 0x1de   :  { %3181 = vset.pattern.permute.xlu0 %v3334_v31 }
 0x1df   :  { %v2836_v34 = vmul.f32 -1.442695, %v236_v32  ;;  %v2840_v36 = vmul.f32 -1.442695, %v436_v35 }
 0x1e1   :  { %3194 = vpow2.f32 %v2836_v34 }
 0x1e2   :  { %3196 = vpow2.f32 %v2840_v36 }
 0x1eb   :  { %v3195_v37 = vpop.eup %3194 }
 0x1ec   :  { %v240_v38 = vadd.f32 1.0, %v3195_v37  ;;  %v3197_v39 = vpop.eup %3196 }
 0x1ed   :  { %v440_v40 = vadd.f32 1.0, %v3197_v39 }
 0x1ee   :  { %3198 = vrcp.f32 %v240_v38 }
 0x1ef   :  { %3200 = vrcp.f32 %v440_v40  ;;  %v3511_v49 = vpop.trf.xlu1 }
 0x1f0   :  { %v256_v52 = vrot.slane %v3511_v49, %v3492_v28  ;;  %v455_v54 = vrot.slane %v3511_v49, %v3497_v30 }
 0x1f2   :  { %v257_v55 = vadd.f32 %v256_v52, %v251_v42  ;;  %v456_v58 = vadd.f32 %v455_v54, %v450_v46  ;;  %v3551_v42 = vld [vmem:[%s3903_s5 + $0x8] sm:$0xff] }
 0x1f3   :  { %2990 = vmatpush3.msra.mxu0 %v3551_v42 }
 0x1f4   :  { %v258_v57 = vsub.f32 %v3522_v56, %v257_v55  ;;  %v457_v61 = vsub.f32 %v3522_v56, %v456_v58  ;;  %2999 = vmatprep.subr.mxu0 %v3322_v10 }
 0x1f6   :  { %v259_v60 = vmul.f32 %v258_v57, %v258_v57  ;;  %v458_v4 = vmul.f32 %v457_v61, %v457_v61  ;;  %v3337_v61 = vmov 103  }
 0x1f8   :  { %v3199_v41 = vpop.eup %3198  ;;  %v260_v1 = vsub.f32 0.0, %v259_v60  ;;  %v459_v14 = vsub.f32 0.0, %v458_v4 }
 0x1f9   :  { %v244_v44 = vsub.f32 1.0, %v3199_v41  ;;  %v3201_v45 = vpop.eup %3200 }
 0x1fa   :  { %v443_v48 = vsub.f32 1.0, %v3201_v45 }
 0x1fb   :  { %v245_v47 = vsel %vm243_vm3, %v3199_v41, %v244_v44 }
 0x1fc   :  { %v246_v50 = vadd.f32 1e-24, %v245_v47  ;;  %v444_v51 = vsel %vm243_vm3, %v3201_v45, %v443_v48 }
 0x1fd   :  { %v445_v53 = vadd.f32 1e-24, %v444_v51 }
 0x1fe   :  { %3202 = vlog2.f32 %v246_v50 }
 0x1ff   :  { %3204 = vlog2.f32 %v445_v53  ;;  %v3566_v53 = vld [vmem:[%s3903_s5] sm:$0xff] }
 0x208   :  { %v3203_v59 = vpop.eup %3202 }
 0x209   :  { %v248_v62 = vmul.f32 0.6931472, %v3203_v59  ;;  %v3205_v63 = vpop.eup %3204 }
 0x20a   :  { %v447_v6 = vmul.f32 0.6931472, %v3205_v63 }
 0x22c   :  { %v334_v0 = vpop.f32.mrb[2].mxu0 }
 0x22d   :  { %v335_v2 = vadd.f32 %v334_v0, %v248_v62  ;;  %v2973_v3 = vpop.f32.mrb[3].mxu0  ;;  %v3583_v62 = vsub.s32 2, %v3489_v26 }
 0x22f   :  { %v338_v5 = vadd.f32 %v335_v2, %v260_v1  ;;  %v781_v0 = vrot.slane %v3494_v29, %v3583_v62 }
 0x230   :  { %v534_v7 = vpop.f32.mrb[4].mxu0 }
 0x231   :  { %v339_v12 = vmul.f32 0.35355338, %v338_v5  ;;  %v535_v18 = vadd.f32 %v534_v7, %v447_v6  ;;  %v2983_v19 = vpop.f32.mrb[5].mxu0 }
 0x233   :  { %v538_v20 = vadd.f32 %v535_v18, %v459_v14  ;;  %v340_v21 = vadd.f32 %v339_v12, %v3529_v11  ;;  %v801_v18 = vrot.slane %v3511_v49, %v3583_v62 }
 0x235   :  { %v539_v22 = vmul.f32 0.35355338, %v538_v20  ;;  %v341_v23 = vsel %vm263_vm2, %v340_v21, -inf }
 0x236   :  { %342 = vmax.xlane.f32.xlu0 %v341_v23 }
 0x237   :  { %v540_v25 = vadd.f32 %v539_v22, %v3529_v11 }
 0x239   :  { %v541_v27 = vsel %vm263_vm2, %v540_v25, -inf }
 0x23a   :  { %542 = vmax.xlane.f32.xlu1 %v541_v27 }
 0x24b   :  { %552 = vrot.lane.b32.xlu1 %v3459_v15, %s3332_s25 }
 0x24f   :  { %806 = vrot.lane.b32.xlu1 %v3459_v15, %s3333_s26 }
 0x253   :  { %795 = vperm.xlu1 %3182, %v3459_v15  }
 0x257   :  { %3184 = vset.pattern.permute.xlu1 %v3337_v61 }
 0x2c3   :  { %v343_v32 = vpop.xlane.xlu0 %342 }
 0x2c4   :  { %v344_v33 = vsub.f32 %v340_v21, %v343_v32 }
 0x2c6   :  { %v345_v34 = vmul.f32 1.442695, %v344_v33 }
 0x2c7   :  { %v543_v35 = vpop.xlane.xlu1 %542 }
 0x2c8   :  { %3206 = vpow2.f32 %v345_v34  ;;  %v544_v36 = vsub.f32 %v540_v25, %v543_v35 }
 0x2ca   :  { %v545_v37 = vmul.f32 1.442695, %v544_v36 }
 0x2cb   :  { %v553_v50 = vpop.permute.xlu1 %552 }
 0x2cc   :  { %3208 = vpow2.f32 %v545_v37 }
 0x2cf   :  { %v807_v60 = vpop.permute.xlu1 %806 }
 0x2d2   :  { %v3207_v38 = vpop.eup %3206 }
 0x2d3   :  { %v347_v39 = vsel %vm263_vm2, %v3207_v38, 0.0  ;;  %v796_v14 = vpop.permute.xlu1 %795 }
 0x2d4   :  { %348 = vadd.xlane.f32.xlu0 %v347_v39  ;;  %v802_v19 = vadd.f32 %v801_v18, %v796_v14 }
 0x2d6   :  { %v3209_v40 = vpop.eup %3208  ;;  %v803_v21 = vsub.f32 %v3522_v56, %v802_v19 }
 0x2d7   :  { %v547_v41 = vsel %vm263_vm2, %v3209_v40, 0.0 }
 0x2d8   :  { %548 = vadd.xlane.f32.xlu0 %v547_v41  ;;  %v804_v27 = vmul.f32 %v803_v21, %v803_v21 }
 0x2da   :  { %v805_v36 = vsub.f32 0.0, %v804_v27 }
 0x2ee   :  { %352 = vrot.lane.b32.xlu0 %v3459_v15, %s3335_s27 }
 0x2f2   :  { %808 = vrot.lane.b32.xlu0 %v3459_v15, %s3336_s28 }
 0x2f6   :  { %775 = vperm.xlu0 %3181, %v3459_v15  }
 0x361   :  { %v349_v44 = vpop.xlane.xlu0 %348 }
 0x362   :  { %3210 = vrcp.f32 %v349_v44 }
 0x365   :  { %v549_v45 = vpop.xlane.xlu0 %548 }
 0x366   :  { %3212 = vrcp.f32 %v549_v45  ;;  %v3340_v45 = vmov 99  }
 0x367   :  { %3183 = vset.pattern.permute.xlu0 %v3340_v45 }
 0x369   :  { %v353_v46 = vpop.permute.xlu0 %352 }
 0x36a   :  { %2975 = vmatpush3.msra.mxu1 %v353_v46 }
 0x36b   :  { %2984 = vmatprep.subr.mxu1 %v3322_v10 }
 0x36c   :  { %v3211_v47 = vpop.eup %3210 }
 0x36d   :  { %v351_v48 = vmul.f32 %v3211_v47, %v3207_v38  ;;  %v809_v58 = vpop.permute.xlu0 %808 }
 0x36f   :  { %2977 = vmatmul.mubr.msk.f32.vlgmr.msra.gmra.mrb[0].mxu1 %vm263_vm2, %v351_v48 }
 0x370   :  { %v3213_v51 = vpop.eup %3212  ;;  %2985 = vmatpush3.msra.mxu1 %v553_v50  ;;  %2986 = vmatprep.mubr.msk.f32.mxu1 %vm3323_vm1, %v3322_v10 }
 0x371   :  { %v551_v52 = vmul.f32 %v3213_v51, %v3209_v40  ;;  %2994 = vmatprep.subr.mxu1 %v3322_v10 }
 0x373   :  { %2987 = vmatmul.mubr.msk.f32.vlgmr.msra.gmra.mrb[2].mxu1 %vm263_vm2, %v551_v52 }
 0x374   :  { %2996 = vmatprep.mubr.msk.f32.mxu1 %vm3323_vm1, %v3322_v10  ;;  %2995 = vmatpush3.msra.mxu1 %v3566_v53 }
 0x375   :  { %3004 = vmatprep.subr.mxu1 %v3322_v10  ;;  %v776_v63 = vpop.permute.xlu0 %775 }
 0x376   :  { %v782_v1 = vadd.f32 %v781_v0, %v776_v63 }
 0x378   :  { %v2846_v2 = vmul.f32 -1.442695, %v782_v1 }
 0x37a   :  { %3214 = vpow2.f32 %v2846_v2 }
 0x384   :  { %v3215_v3 = vpop.eup %3214 }
 0x385   :  { %v786_v4 = vadd.f32 1.0, %v3215_v3 }
 0x387   :  { %3216 = vrcp.f32 %v786_v4 }
 0x391   :  { %v3217_v5 = vpop.eup %3216 }
 0x392   :  { %v789_v6 = vsub.f32 1.0, %v3217_v5 }
 0x394   :  { %v790_v7 = vsel %vm243_vm3, %v3217_v5, %v789_v6 }
 0x395   :  { %v791_v12 = vadd.f32 1e-24, %v790_v7 }
 0x397   :  { %3218 = vlog2.f32 %v791_v12 }
 0x3a1   :  { %v3219_v23 = vpop.eup %3218 }
 0x3a2   :  { %v793_v34 = vmul.f32 0.6931472, %v3219_v23 }
 0x442   :  { %v424_v54 = vpop.f32.mrb[0].mxu1 }
 0x443   :  { %v2978_v55 = vpop.f32.mrb[1].mxu1  ;;  %2997 = vmatmul.mubr.msk.f32.vlgmr.msra.gmra.mrb[4].mxu1 %vm263_vm2, %v424_v54 }
 0x444   :  { %3006 = vmatprep.mubr.msk.f32.mxu1 %vm3323_vm1, %v3322_v10 }
 0x446   :  { %v624_v57 = vpop.f32.mrb[2].mxu1 }
 0x447   :  { %v2988_v59 = vpop.f32.mrb[3].mxu1  ;;  %2992 = vmatmul.mubr.msk.f32.vlgmr.msra.gmra.mrb[6].mxu0 %vm263_vm2, %v624_v57 }
 0x448   :  { %3000 = vmatpush3.xpose.msk.msra.mxu0 %vm263_vm2, %v809_v58  ;;  %3001 = vmatprep.mubr.msk.f32.mxu0 %vm3323_vm1, %v3322_v10  ;;  %v3625_v59 = vsub.s32 3, %v3489_v26 }
 0x449   :  { %3009 = vmatprep.subr.mxu0 %v3322_v10 }
 0x44a   :  { %v1055_v63 = vrot.slane %v3494_v29, %v3625_v59  ;;  %v1075_v26 = vrot.slane %v3511_v49, %v3625_v59 }
 0x44b   :  { %3002 = vmatmul.mubr.msk.f32.vlgmr.msra.gmra.mrb[8].mxu0 %vm263_vm2, %v807_v60 }
 0x44c   :  { %3011 = vmatprep.mubr.msk.f32.mxu0 %vm3323_vm1, %v3322_v10 }
 0x516   :  { %v770_v20 = vpop.f32.mrb[4].mxu1 }
 0x517   :  { %v2998_v22 = vpop.f32.mrb[5].mxu1 }
 0x51a   :  { %v697_v25 = vpop.f32.mrb[6].mxu0 }
 0x51b   :  { %v3592_v32 = vadd.f32 %v770_v20, %v697_v25  ;;  %v2993_v33 = vpop.f32.mrb[7].mxu0 }
 0x51e   :  { %v880_v35 = vpop.f32.mrb[8].mxu0 }
 0x51f   :  { %v881_v37 = vadd.f32 %v880_v35, %v793_v34  ;;  %v3003_v38 = vpop.f32.mrb[9].mxu0 }
 0x521   :  { %v884_v39 = vadd.f32 %v881_v37, %v805_v36 }
 0x523   :  { %v885_v40 = vmul.f32 0.35355338, %v884_v39 }
 0x525   :  { %v886_v41 = vadd.f32 %v885_v40, %v3529_v11 }
 0x527   :  { %v887_v44 = vsel %vm263_vm2, %v886_v41, -inf }
 0x528   :  { %888 = vmax.xlane.f32.xlu1 %v887_v44 }
 0x539   :  { %1082 = vrot.lane.b32.xlu1 %v3459_v15, %s3338_s21 }
 0x53d   :  { %1080 = vrot.lane.b32.xlu1 %v3459_v15, %s3339_s22 }
 0x541   :  { %1069 = vperm.xlu1 %3184, %v3459_v15  }
 0x545   :  { %3186 = vset.pattern.permute.xlu1 %v3320_v8 }
 0x5b5   :  { %v889_v46 = vpop.xlane.xlu1 %888 }
 0x5b6   :  { %v890_v47 = vsub.f32 %v886_v41, %v889_v46 }
 0x5b8   :  { %v891_v48 = vmul.f32 1.442695, %v890_v47 }
 0x5b9   :  { %v1083_v55 = vpop.permute.xlu1 %1082 }
 0x5ba   :  { %3220 = vpow2.f32 %v891_v48 }
 0x5bd   :  { %v1081_v58 = vpop.permute.xlu1 %1080 }
 0x5c1   :  { %v1070_v12 = vpop.permute.xlu1 %1069 }
 0x5c2   :  { %v1076_v14 = vadd.f32 %v1075_v26, %v1070_v12 }
 0x5c4   :  { %v3221_v50 = vpop.eup %3220  ;;  %v1077_v29 = vsub.f32 %v3522_v56, %v1076_v14 }
 0x5c5   :  { %v893_v51 = vsel %vm263_vm2, %v3221_v50, 0.0 }
 0x5c6   :  { %894 = vadd.xlane.f32.xlu0 %v893_v51  ;;  %v1078_v20 = vmul.f32 %v1077_v29, %v1077_v29 }
 0x5c8   :  { %v1079_v25 = vsub.f32 0.0, %v1078_v20 }
 0x5dc   :  { %898 = vrot.lane.b32.xlu0 %v3459_v15, %s3341_s23 }
 0x5e0   :  { %1049 = vperm.xlu0 %3183, %v3459_v15  }
 0x5e4   :  { %3185 = vset.pattern.permute.xlu0 %v3321_v9  ;;  %v3620_v9 = vld [vmem:[%s3903_s5 + $0x10] sm:$0xff] }
 0x5e5   :  { %3010 = vmatpush3.msra.mxu0 %v3620_v9 }
 0x5e6   :  { %3019 = vmatprep.subr.mxu0 %v3322_v10 }
 0x653   :  { %v895_v8 = vpop.xlane.xlu0 %894 }
 0x654   :  { %3222 = vrcp.f32 %v895_v8 }
 0x657   :  { %v899_v52 = vpop.permute.xlu0 %898 }
 0x658   :  { %3005 = vmatpush3.msra.mxu1 %v899_v52 }
 0x659   :  { %3014 = vmatprep.subr.mxu1 %v3322_v10 }
 0x65e   :  { %v3223_v54 = vpop.eup %3222 }
 0x65f   :  { %v897_v57 = vmul.f32 %v3223_v54, %v3221_v50  ;;  %v1050_v60 = vpop.permute.xlu0 %1049 }
 0x660   :  { %v1056_v0 = vadd.f32 %v1055_v63, %v1050_v60 }
 0x661   :  { %3007 = vmatmul.mubr.msk.f32.vlgmr.msra.gmra.mrb[6].mxu1 %vm263_vm2, %v897_v57 }
 0x662   :  { %3015 = vmatpush3.xpose.msk.msra.mxu1 %vm263_vm2, %v1083_v55  ;;  %3016 = vmatprep.mubr.msk.f32.mxu1 %vm3323_vm1, %v3322_v10  ;;  %v2851_v1 = vmul.f32 -1.442695, %v1056_v0 }
 0x663   :  { %3024 = vmatprep.subr.mxu1 %v3322_v10 }
 0x664   :  { %3224 = vpow2.f32 %v2851_v1 }
 0x665   :  { %3017 = vmatmul.mubr.msk.f32.vlgmr.msra.gmra.mrb[8].mxu1 %vm263_vm2, %v1081_v58 }
 0x666   :  { %3026 = vmatprep.mubr.msk.f32.mxu1 %vm3323_vm1, %v3322_v10 }
 0x66e   :  { %v3225_v2 = vpop.eup %3224 }
 0x66f   :  { %v1060_v3 = vadd.f32 1.0, %v3225_v2 }
 0x671   :  { %3226 = vrcp.f32 %v1060_v3 }
 0x67b   :  { %v3227_v4 = vpop.eup %3226 }
 0x67c   :  { %v1063_v5 = vsub.f32 1.0, %v3227_v4 }
 0x67e   :  { %v1064_v6 = vsel %vm243_vm3, %v3227_v4, %v1063_v5 }
 0x67f   :  { %v1065_v7 = vadd.f32 1e-24, %v1064_v6 }
 0x681   :  { %3228 = vlog2.f32 %v1065_v7 }
 0x68b   :  { %v3229_v18 = vpop.eup %3228 }
 0x68c   :  { %v1067_v22 = vmul.f32 0.6931472, %v3229_v18 }
 0x734   :  { %v970_v19 = vpop.f32.mrb[6].mxu1 }
 0x735   :  { %v3008_v21 = vpop.f32.mrb[7].mxu1  ;;  %3012 = vmatmul.mubr.msk.f32.vlgmr.msra.gmra.mrb[10].mxu0 %vm263_vm2, %v970_v19 }
 0x736   :  { %3021 = vmatprep.mubr.msk.f32.mxu0 %vm3323_vm1, %v3322_v10 }
 0x738   :  { %v1154_v23 = vpop.f32.mrb[8].mxu1 }
 0x739   :  { %v1155_v27 = vadd.f32 %v1154_v23, %v1067_v22  ;;  %v3018_v33 = vpop.f32.mrb[9].mxu1 }
 0x73b   :  { %v1158_v34 = vadd.f32 %v1155_v27, %v1079_v25 }
 0x73d   :  { %v1159_v35 = vmul.f32 0.35355338, %v1158_v34 }
 0x73f   :  { %v1160_v49 = vadd.f32 %v1159_v35, %v3529_v11 }
 0x741   :  { %v1161_v36 = vsel %vm263_vm2, %v1160_v49, -inf }
 0x742   :  { %1162 = vmax.xlane.f32.xlu1 %v1161_v36 }
 0x753   :  { %1470 = vrot.lane.b32.xlu1 %v3457_v13, %s3325_s17  ;;  %s3342_s17 = smov 40  }
 0x757   :  { %1670 = vrot.lane.b32.xlu1 %v3457_v13, %s3327_s19 }
 0x75b   :  { %1368 = vrot.lane.b32.xlu1 %v3457_v13, %s3326_s18 }
 0x75f   :  { %1637 = vperm.xlu1 %3186, %v3457_v13  }
 0x763   :  { %1403 = vrot.lane.b32.xlu1 %v3457_v13, %s3328_s4 }
 0x764   :  { %3187 = vset.pattern.permute.xlu1 %v3329_v16 }
 0x767   :  { %1459 = vperm.xlu1 %3187, %v3457_v13  }
 0x76b   :  { %3188 = vset.pattern.permute.xlu1 %v3330_v17 }
 0x76c   :  { %1657 = vperm.xlu1 %3188, %v3457_v13  }
 0x7cf   :  { %v1163_v11 = vpop.xlane.xlu1 %1162 }
 0x7d0   :  { %v1164_v37 = vsub.f32 %v1160_v49, %v1163_v11 }
 0x7d2   :  { %v1165_v38 = vmul.f32 1.442695, %v1164_v37 }
 0x7d3   :  { %v1471_v39 = vpop.permute.xlu1 %1470 }
 0x7d4   :  { %3230 = vpow2.f32 %v1165_v38 }
 0x7d7   :  { %v1671_v40 = vpop.permute.xlu1 %1670 }
 0x7db   :  { %v1369_v41 = vpop.permute.xlu1 %1368 }
 0x7de   :  { %v3231_v44 = vpop.eup %3230 }
 0x7df   :  { %v1638_v46 = vpop.permute.xlu1 %1637  ;;  %v1167_v47 = vsel %vm263_vm2, %v3231_v44, 0.0 }
 0x7e0   :  { %1168 = vadd.xlane.f32.xlu0 %v1167_v47  ;;  %v3711_v47 = vld [vmem:[%s3899_s1 + $0x8] sm:$0xff] }
 0x7e3   :  { %v1404_v48 = vpop.permute.xlu1 %1403 }
 0x7e4   :  { %1406 = vxpose.xlu1.b32.start.end [1/1] (short) (narrow) %v1404_v48, 8 }
 0x7e7   :  { %v1460_v5 = vpop.permute.xlu1 %1459 }
 0x7eb   :  { %v1658_v12 = vpop.permute.xlu1 %1657 }
 0x7f6   :  { %1172 = vrot.lane.b32.xlu0 %v3459_v15, %s3342_s17 }
 0x7fa   :  { %1668 = vrot.lane.b32.xlu0 %v3457_v13, %s3324_s16 }
 0x7fe   :  { %1439 = vperm.xlu0 %3185, %v3457_v13  }
 0x802   :  { %3190 = vset.pattern.permute.xlu1 %v3331_v24 }
 0x808   :  { %v1043_v16 = vpop.f32.mrb[10].mxu0 }
 0x809   :  { %v3660_v17 = vadd.f32 %v1043_v16, %v3592_v32  ;;  %v3013_v50 = vpop.f32.mrb[11].mxu0 }
 0x81c   :  { %1371 = vxpose.xlu0.b32.start.end [1/1] (short) (narrow) %v1369_v41, 8 }
 0x845   :  { %3189 = vset.pattern.permute.xlu0 %v3334_v31  ;;  %v3683_v31 = vld [vmem:[%s3903_s5 + $0x18] sm:$0xff] }
 0x846   :  { %3025 = vmatpush3.msra.mxu1 %v3683_v31 }
 0x847   :  { %3034 = vmatprep.subr.mxu1 %v3322_v10 }
 0x864   :  { %v3695_v29 = vpop.trf.xlu1 }
 0x865   :  { %v1465_v20 = vrot.slane %v3695_v29, %v3492_v28  ;;  %v1663_v22 = vrot.slane %v3695_v29, %v3497_v30 }
 0x867   :  { %v1466_v23 = vadd.f32 %v1465_v20, %v1460_v5  ;;  %v1664_v27 = vadd.f32 %v1663_v22, %v1658_v12 }
 0x869   :  { %v1467_v25 = vsub.f32 %v3522_v56, %v1466_v23  ;;  %v1665_v36 = vsub.f32 %v3522_v56, %v1664_v27 }
 0x86b   :  { %v1468_v49 = vmul.f32 %v1467_v25, %v1467_v25 }
 0x86d   :  { %v1169_v51 = vpop.xlane.xlu0 %1168 }
 0x86e   :  { %3232 = vrcp.f32 %v1169_v51 }
 0x871   :  { %v1173_v8 = vpop.permute.xlu0 %1172 }
 0x872   :  { %3020 = vmatpush3.msra.mxu0 %v1173_v8 }
 0x873   :  { %3029 = vmatprep.subr.mxu0 %v3322_v10 }
 0x875   :  { %v1669_v24 = vpop.permute.xlu0 %1668 }
 0x878   :  { %v3233_v15 = vpop.eup %3232 }
 0x879   :  { %v1171_v52 = vmul.f32 %v3233_v15, %v3231_v44 }
 0x87b   :  { %3022 = vmatmul.mubr.msk.f32.vlgmr.msra.gmra.mrb[12].mxu0 %vm263_vm2, %v1171_v52 }
 0x87c   :  { %3030 = vmatpush3.xpose.msk.msra.mxu0 %vm263_vm2, %v1471_v39  ;;  %3031 = vmatprep.mubr.msk.f32.mxu0 %vm3323_vm1, %v3322_v10 }
 0x87d   :  { %3039 = vmatprep.subr.mxu0 %v3322_v10  ;;  %v1440_v32 = vpop.permute.xlu0 %1439 }
 0x87f   :  { %3032 = vmatmul.mubr.msk.f32.vlgmr.msra.gmra.mrb[14].mxu0 %vm263_vm2, %v3457_v13 }
 0x880   :  { %3040 = vmatpush3.xpose.msk.msra.mxu0 %vm263_vm2, %v1671_v40  ;;  %3041 = vmatprep.mubr.msk.f32.mxu0 %vm3323_vm1, %v3322_v10  ;;  %v1666_v40 = vmul.f32 %v1665_v36, %v1665_v36 }
 0x881   :  { %3049 = vmatprep.subr.mxu0 %v3322_v10 }
 0x882   :  { %v1667_v16 = vsub.f32 0.0, %v1666_v40 }
 0x883   :  { %3042 = vmatmul.mubr.msk.f32.vlgmr.msra.gmra.mrb[16].mxu0 %vm263_vm2, %v1669_v24 }
 0x884   :  { %3050 = vmatpush3.msra.mxu0 %v3551_v42  ;;  %3051 = vmatprep.mubr.msk.f32.mxu0 %vm3323_vm1, %v3322_v10 }
 0x885   :  { %3059 = vmatprep.subr.mxu0 %v3322_v10 }
 0x89c   :  { %v3687_v54 = vpop.trf.xlu0 }
 0x89d   :  { %v1445_v42 = vrot.slane %v3687_v54, %v3492_v28  ;;  %v1643_v57 = vrot.slane %v3687_v54, %v3497_v30  ;;  %v1469_v30 = vsub.f32 0.0, %v1468_v49 }
 0x89f   :  { %v1446_v55 = vadd.f32 %v1445_v42, %v1440_v32  ;;  %v1644_v60 = vadd.f32 %v1643_v57, %v1638_v46 }
 0x8a1   :  { %v2860_v58 = vmul.f32 -1.442695, %v1446_v55  ;;  %v2864_v63 = vmul.f32 -1.442695, %v1644_v60 }
 0x8a3   :  { %3234 = vpow2.f32 %v2860_v58 }
 0x8a4   :  { %3236 = vpow2.f32 %v2864_v63 }
 0x8ad   :  { %v3235_v0 = vpop.eup %3234 }
 0x8ae   :  { %v1450_v1 = vadd.f32 1.0, %v3235_v0  ;;  %v3237_v2 = vpop.eup %3236 }
 0x8af   :  { %v1648_v3 = vadd.f32 1.0, %v3237_v2 }
 0x8b0   :  { %3238 = vrcp.f32 %v1450_v1 }
 0x8b1   :  { %3240 = vrcp.f32 %v1648_v3 }
 0x8ba   :  { %v3239_v4 = vpop.eup %3238 }
 0x8bb   :  { %v1453_v6 = vsub.f32 1.0, %v3239_v4  ;;  %v3241_v7 = vpop.eup %3240 }
 0x8bc   :  { %v1651_v14 = vsub.f32 1.0, %v3241_v7 }
 0x8bd   :  { %v1454_v26 = vsel %vm243_vm3, %v3239_v4, %v1453_v6 }
 0x8be   :  { %v1455_v18 = vadd.f32 1e-24, %v1454_v26  ;;  %v1652_v19 = vsel %vm243_vm3, %v3241_v7, %v1651_v14 }
 0x8bf   :  { %v1653_v21 = vadd.f32 1e-24, %v1652_v19 }
 0x8c0   :  { %3242 = vlog2.f32 %v1455_v18 }
 0x8c1   :  { %3244 = vlog2.f32 %v1653_v21 }
 0x8ca   :  { %v3243_v33 = vpop.eup %3242 }
 0x8cb   :  { %v1457_v28 = vmul.f32 0.6931472, %v3243_v33  ;;  %v3245_v11 = vpop.eup %3244 }
 0x8cc   :  { %v1655_v44 = vmul.f32 0.6931472, %v3245_v11 }
 0x94e   :  { %v1244_v34 = vpop.f32.mrb[12].mxu0 }
 0x94f   :  { %v3023_v35 = vpop.f32.mrb[13].mxu0  ;;  %3027 = vmatmul.mubr.msk.f32.vlgmr.msra.gmra.mrb[10].mxu1 %vm263_vm2, %v1244_v34  ;;  %v1989_v34 = vrot.slane %v3687_v54, %v3583_v62 }
 0x950   :  { %3036 = vmatprep.mubr.msk.f32.mxu1 %vm3323_vm1, %v3322_v10 }
 0x952   :  { %v1542_v37 = vpop.f32.mrb[14].mxu0 }
 0x953   :  { %v1543_v38 = vadd.f32 %v1542_v37, %v1457_v28  ;;  %v3033_v39 = vpop.f32.mrb[15].mxu0 }
 0x954   :  { %v2009_v39 = vrot.slane %v3695_v29, %v3583_v62 }
 0x955   :  { %v1546_v41 = vadd.f32 %v1543_v38, %v1469_v30 }
 0x956   :  { %v1742_v46 = vpop.f32.mrb[16].mxu0 }
 0x957   :  { %v1547_v48 = vmul.f32 0.35355338, %v1546_v41  ;;  %v1743_v50 = vadd.f32 %v1742_v46, %v1655_v44  ;;  %v3043_v51 = vpop.f32.mrb[17].mxu0 }
 0x959   :  { %v1746_v8 = vadd.f32 %v1743_v50, %v1667_v16  ;;  %v1548_v15 = vadd.f32 %v3711_v47, %v1547_v48 }
 0x95b   :  { %v1747_v52 = vmul.f32 0.35355338, %v1746_v8  ;;  %v1549_v24 = vsel %vm263_vm2, %v1548_v15, -inf }
 0x95c   :  { %1550 = vmax.xlane.f32.xlu0 %v1549_v24 }
 0x95d   :  { %v1748_v32 = vadd.f32 %v3711_v47, %v1747_v52 }
 0x95f   :  { %v1749_v42 = vsel %vm263_vm2, %v1748_v32, -inf }
 0x960   :  { %1750 = vmax.xlane.f32.xlu1 %v1749_v42 }
 0x971   :  { %1760 = vrot.lane.b32.xlu1 %v3457_v13, %s3332_s25 }
 0x975   :  { %2014 = vrot.lane.b32.xlu1 %v3457_v13, %s3333_s26 }
 0x979   :  { %2003 = vperm.xlu1 %3190, %v3457_v13  }
 0x97d   :  { %3192 = vset.pattern.permute.xlu1 %v3337_v61 }
 0x9e9   :  { %v1551_v55 = vpop.xlane.xlu0 %1550 }
 0x9ea   :  { %v1552_v57 = vsub.f32 %v1548_v15, %v1551_v55 }
 0x9ec   :  { %v1553_v58 = vmul.f32 1.442695, %v1552_v57 }
 0x9ed   :  { %v1751_v60 = vpop.xlane.xlu1 %1750 }
 0x9ee   :  { %3246 = vpow2.f32 %v1553_v58  ;;  %v1752_v63 = vsub.f32 %v1748_v32, %v1751_v60 }
 0x9f0   :  { %v1753_v0 = vmul.f32 1.442695, %v1752_v63 }
 0x9f1   :  { %v1761_v20 = vpop.permute.xlu1 %1760 }
 0x9f2   :  { %3248 = vpow2.f32 %v1753_v0 }
 0x9f8   :  { %v3247_v1 = vpop.eup %3246 }
 0x9f9   :  { %v1555_v2 = vsel %vm263_vm2, %v3247_v1, 0.0 }
 0x9fa   :  { %1556 = vadd.xlane.f32.xlu0 %v1555_v2 }
 0x9fc   :  { %v3249_v3 = vpop.eup %3248 }
 0x9fd   :  { %v1755_v4 = vsel %vm263_vm2, %v3249_v3, 0.0 }
 0x9fe   :  { %1756 = vadd.xlane.f32.xlu0 %v1755_v4 }
 0xa14   :  { %1560 = vrot.lane.b32.xlu0 %v3457_v13, %s3335_s27 }
 0xa18   :  { %2016 = vrot.lane.b32.xlu0 %v3457_v13, %s3336_s28 }
 0xa1c   :  { %1983 = vperm.xlu0 %3189, %v3457_v13  }
 0xa20   :  { %3191 = vset.pattern.permute.xlu0 %v3340_v45 }
 0xa22   :  { %v1317_v5 = vpop.f32.mrb[10].mxu1 }
 0xa23   :  { %v3732_v6 = vadd.f32 %v1317_v5, %v3660_v17  ;;  %v3028_v7 = vpop.f32.mrb[11].mxu1 }
 0xa87   :  { %v1557_v12 = vpop.xlane.xlu0 %1556 }
 0xa88   :  { %3250 = vrcp.f32 %v1557_v12 }
 0xa8b   :  { %v1757_v26 = vpop.xlane.xlu0 %1756 }
 0xa8c   :  { %3252 = vrcp.f32 %v1757_v26 }
 0xa8f   :  { %v1561_v14 = vpop.permute.xlu0 %1560 }
 0xa90   :  { %3035 = vmatpush3.msra.mxu1 %v1561_v14  ;;  %v2263_v14 = vrot.slane %v3687_v54, %v3625_v59 }
 0xa91   :  { %3044 = vmatprep.subr.mxu1 %v3322_v10 }
 0xa92   :  { %v3251_v18 = vpop.eup %3250 }
 0xa93   :  { %v1559_v19 = vmul.f32 %v3251_v18, %v3247_v1  ;;  %v2017_v25 = vpop.permute.xlu0 %2016 }
 0xa95   :  { %3037 = vmatmul.mubr.msk.f32.vlgmr.msra.gmra.mrb[12].mxu1 %vm263_vm2, %v1559_v19 }
 0xa96   :  { %v3253_v21 = vpop.eup %3252  ;;  %3045 = vmatpush3.msra.mxu1 %v1761_v20  ;;  %3046 = vmatprep.mubr.msk.f32.mxu1 %vm3323_vm1, %v3322_v10 }
 0xa97   :  { %v1759_v45 = vmul.f32 %v3253_v21, %v3249_v3  ;;  %3054 = vmatprep.subr.mxu1 %v3322_v10 }
 0xa99   :  { %3047 = vmatmul.mubr.msk.f32.vlgmr.msra.gmra.mrb[14].mxu1 %vm263_vm2, %v1759_v45 }
 0xa9a   :  { %3055 = vmatpush3.msra.mxu1 %v3566_v53  ;;  %3056 = vmatprep.mubr.msk.f32.mxu1 %vm3323_vm1, %v3322_v10  ;;  %v2015_v53 = vpop.permute.xlu1 %2014 }
 0xa9b   :  { %3064 = vmatprep.subr.mxu1 %v3322_v10  ;;  %v1984_v33 = vpop.permute.xlu0 %1983 }
 0xa9c   :  { %v1990_v35 = vadd.f32 %v1989_v34, %v1984_v33 }
 0xa9e   :  { %v2870_v49 = vmul.f32 -1.442695, %v1990_v35  ;;  %v2004_v38 = vpop.permute.xlu1 %2003 }
 0xa9f   :  { %v2010_v40 = vadd.f32 %v2009_v39, %v2004_v38 }
 0xaa0   :  { %3254 = vpow2.f32 %v2870_v49 }
 0xaa1   :  { %v2011_v44 = vsub.f32 %v3522_v56, %v2010_v40 }
 0xaa3   :  { %v2012_v50 = vmul.f32 %v2011_v44, %v2011_v44 }
 0xaa5   :  { %v2013_v24 = vsub.f32 0.0, %v2012_v50 }
 0xaaa   :  { %v3255_v36 = vpop.eup %3254 }
 0xaab   :  { %v1994_v28 = vadd.f32 1.0, %v3255_v36 }
 0xaad   :  { %3256 = vrcp.f32 %v1994_v28 }
 0xab7   :  { %v3257_v11 = vpop.eup %3256 }
 0xab8   :  { %v1997_v37 = vsub.f32 1.0, %v3257_v11 }
 0xb68   :  { %v1632_v17 = vpop.f32.mrb[12].mxu1 }
 0xb69   :  { %v3038_v22 = vpop.f32.mrb[13].mxu1  ;;  %3057 = vmatmul.mubr.msk.f32.vlgmr.msra.gmra.mrb[16].mxu1 %vm263_vm2, %v1632_v17 }
 0xb6a   :  { %3066 = vmatprep.mubr.msk.f32.mxu1 %vm3323_vm1, %v3322_v10 }
 0xb6c   :  { %v1832_v23 = vpop.f32.mrb[14].mxu1 }
 0xb6d   :  { %v3048_v27 = vpop.f32.mrb[15].mxu1  ;;  %3052 = vmatmul.mubr.msk.f32.vlgmr.msra.gmra.mrb[18].mxu0 %vm263_vm2, %v1832_v23 }
 0xb6e   :  { %3060 = vmatpush3.xpose.msk.msra.mxu0 %vm263_vm2, %v2017_v25  ;;  %3061 = vmatprep.mubr.msk.f32.mxu0 %vm3323_vm1, %v3322_v10  ;;  %v2283_v25 = vrot.slane %v3695_v29, %v3625_v59  ;;  %v2856_v59 = vld [vmem:[%s3904_s6] ss:$0 sm:$0xff] }
 0xb6f   :  { %3069 = vmatprep.subr.mxu0 %v3322_v10 }
 0xb71   :  { %3062 = vmatmul.mubr.msk.f32.vlgmr.msra.gmra.mrb[20].mxu0 %vm263_vm2, %v2015_v53 }
 0xb72   :  { %3070 = vmatpush3.msra.mxu0 %v3620_v9  ;;  %3071 = vmatprep.mubr.msk.f32.mxu0 %vm3323_vm1, %v3322_v10  ;;  %v1998_v9 = vsel %vm243_vm3, %v3257_v11, %v1997_v37 }
 0xb73   :  { %3079 = vmatprep.subr.mxu0 %v3322_v10  ;;  %v1999_v30 = vadd.f32 1e-24, %v1998_v9 }
 0xb75   :  { %3258 = vlog2.f32 %v1999_v30 }
 0xb7f   :  { %v3259_v48 = vpop.eup %3258 }
 0xb80   :  { %v2001_v15 = vmul.f32 0.6931472, %v3259_v48 }
 0xc3c   :  { %v1978_v41 = vpop.f32.mrb[16].mxu1 }
 0xc3d   :  { %v3058_v46 = vpop.f32.mrb[17].mxu1 }
 0xc40   :  { %v1905_v16 = vpop.f32.mrb[18].mxu0 }
 0xc41   :  { %v3764_v51 = vadd.f32 %v1978_v41, %v1905_v16  ;;  %v3053_v8 = vpop.f32.mrb[19].mxu0 }
 0xc44   :  { %v2088_v52 = vpop.f32.mrb[20].mxu0 }
 0xc45   :  { %v2089_v32 = vadd.f32 %v2088_v52, %v2001_v15  ;;  %v3063_v42 = vpop.f32.mrb[21].mxu0 }
 0xc47   :  { %v2092_v55 = vadd.f32 %v2089_v32, %v2013_v24 }
 0xc49   :  { %v2093_v57 = vmul.f32 0.35355338, %v2092_v55 }
 0xc4b   :  { %v2094_v62 = vadd.f32 %v3711_v47, %v2093_v57 }
 0xc4d   :  { %v2095_v58 = vsel %vm263_vm2, %v2094_v62, -inf }
 0xc4e   :  { %2096 = vmax.xlane.f32.xlu1 %v2095_v58 }
 0xc5f   :  { %2290 = vrot.lane.b32.xlu1 %v3457_v13, %s3338_s21 }
 0xc63   :  { %2288 = vrot.lane.b32.xlu1 %v3457_v13, %s3339_s22 }
 0xc67   :  { %2277 = vperm.xlu1 %3192, %v3457_v13  }
 0xcdb   :  { %v2097_v60 = vpop.xlane.xlu1 %2096 }
 0xcdc   :  { %v2098_v63 = vsub.f32 %v2094_v62, %v2097_v60  ;;  %v3295_v60 = vld [vmem:[%s3898_s0 + $0x8] sm:$0xff] }
 0xcde   :  { %v2099_v0 = vmul.f32 1.442695, %v2098_v63 }
 0xcdf   :  { %v2291_v7 = vpop.permute.xlu1 %2290 }
 0xce0   :  { %3260 = vpow2.f32 %v2099_v0 }
 0xce3   :  { %v2289_v26 = vpop.permute.xlu1 %2288 }
 0xcea   :  { %v3261_v1 = vpop.eup %3260 }
 0xceb   :  { %v2101_v2 = vsel %vm263_vm2, %v3261_v1, 0.0 }
 0xcec   :  { %2102 = vadd.xlane.f32.xlu0 %v2101_v2 }
 0xd02   :  { %2106 = vrot.lane.b32.xlu0 %v3457_v13, %s3341_s23 }
 0xd06   :  { %2257 = vperm.xlu0 %3191, %v3457_v13  }
 0xd0a   :  { %3193 = vset.pattern.permute.xlu0 %v3337_v61 }
 0xd79   :  { %v2103_v3 = vpop.xlane.xlu0 %2102 }
 0xd7a   :  { %3262 = vrcp.f32 %v2103_v3 }
 0xd7d   :  { %v2107_v4 = vpop.permute.xlu0 %2106 }
 0xd7e   :  { %3065 = vmatpush3.msra.mxu1 %v2107_v4 }
 0xd7f   :  { %3074 = vmatprep.subr.mxu1 %v3322_v10 }
 0xd84   :  { %v3263_v5 = vpop.eup %3262 }
 0xd85   :  { %v2105_v12 = vmul.f32 %v3263_v5, %v3261_v1  ;;  %v2258_v61 = vpop.permute.xlu0 %2257 }
 0xd86   :  { %v2264_v18 = vadd.f32 %v2263_v14, %v2258_v61 }
 0xd87   :  { %3067 = vmatmul.mubr.msk.f32.vlgmr.msra.gmra.mrb[18].mxu1 %vm263_vm2, %v2105_v12 }
 0xd88   :  { %3075 = vmatpush3.xpose.msk.msra.mxu1 %vm263_vm2, %v2291_v7  ;;  %3076 = vmatprep.mubr.msk.f32.mxu1 %vm3323_vm1, %v3322_v10  ;;  %v2875_v19 = vmul.f32 -1.442695, %v2264_v18 }
 0xd89   :  { %3084 = vmatprep.subr.mxu1 %v3322_v10 }
 0xd8a   :  { %3264 = vpow2.f32 %v2875_v19 }
 0xd8b   :  { %3077 = vmatmul.mubr.msk.f32.vlgmr.msra.gmra.mrb[20].mxu1 %vm263_vm2, %v2289_v26 }
 0xd8c   :  { %3085 = vmatpush3.msra.mxu1 %v3683_v31  ;;  %3086 = vmatprep.mubr.msk.f32.mxu1 %vm3323_vm1, %v3322_v10  ;;  %v2278_v31 = vpop.permute.xlu1 %2277 }
 0xd8d   :  { %v2284_v27 = vadd.f32 %v2283_v25, %v2278_v31  ;;  %v2858_v31 = vld [vmem:[%s3906_s8] ss:$0 sm:$0xff] }
 0xd8f   :  { %v2285_v54 = vsub.f32 %v3522_v56, %v2284_v27  ;;  %v1328_v56 = vadd.f32 %v2856_v59, %v3732_v6 }
 0xd91   :  { %v2286_v34 = vmul.f32 %v2285_v54, %v2285_v54  ;;  %v2554_v54 = vld [vmem:[%s3907_s9] sm:$0xff] }
 0xd93   :  { %v2287_v36 = vsub.f32 0.0, %v2286_v34 }
 0xd94   :  { %v3265_v20 = vpop.eup %3264 }
 0xd95   :  { %v2268_v21 = vadd.f32 1.0, %v3265_v20 }
 0xd97   :  { %3266 = vrcp.f32 %v2268_v21 }
 0xda1   :  { %v3267_v45 = vpop.eup %3266 }
 0xda2   :  { %v2271_v17 = vsub.f32 1.0, %v3267_v45 }
 0xda4   :  { %v2272_v22 = vsel %vm243_vm3, %v3267_v45, %v2271_v17 }
 0xda5   :  { %v2273_v23 = vadd.f32 1e-24, %v2272_v22  ;;  %v2857_v22 = vld [vmem:[%s3905_s7] ss:$0 sm:$0xff]  ;;  %s3343_s7 = smov [#allocation2]  }
 0xda6   :  { %s2821_s23 = sshll.u32 %s3343_s7, 4  ;;  %s2822_s23 = int_to_ptr.vmem [resolvable:$true] %s2821_s23 }
 0xda7   :  { %3268 = vlog2.f32 %v2273_v23  ;;  %s3296_s8 = scalar_lea.vmem %s2822_s23, 256  ;;  %p3301_p1 = scmp.lt.s32.totalorder %s2822_s23, %s2822_s23 }
 0xda8   :  { %p3297_p0 = scmp.ne.s32.totalorder %s2822_s23, %s3296_s8  ;;  %p3302_p2 = scmp.lt.s32.totalorder %s3296_s8, %s3296_s8 }
 0xdaa   :  { %p3303_p3 = por %p3302_p2, %p3301_p1 }
 0xdac   :  { %p3304_p4 = pnand %p3303_p3, %p3297_p0 }
 0xdb1   :  { %v3269_v53 = vpop.eup %3268 }
 0xdb2   :  { %v2275_v43 = vmul.f32 0.6931472, %v3269_v53  ;;  %v2555_v53 = vld [vmem:[%s3907_s9 + $0x8] sm:$0xff] }
 0xdb3   :  { %v3127_v34 = vpack.c.bf16 %v2555_v53, %v2554_v54 }
 0xe5a   :  { %v2178_v33 = vpop.f32.mrb[18].mxu1 }
 0xe5b   :  { %v3068_v35 = vpop.f32.mrb[19].mxu1  ;;  %3072 = vmatmul.mubr.msk.f32.vlgmr.msra.gmra.mrb[22].mxu0 %vm263_vm2, %v2178_v33  ;;  %v2556_v33 = vld [vmem:[%s3907_s9 + $0x10] sm:$0xff] }
 0xe5c   :  { %3081 = vmatprep.mubr.msk.f32.mxu0 %vm3323_vm1, %v3322_v10  ;;  %v3294_v10 = vld [vmem:[%s3898_s0] sm:$0xff]  ;;  %v2557_v35 = vld [vmem:[%s3907_s9 + $0x18] sm:$0xff] }
 0xe5d   :  { %v1329_v38 = vadd.f32 %v3294_v10, %v1328_v56 }
 0xe5e   :  { %v2362_v49 = vpop.f32.mrb[20].mxu1 }
 0xe5f   :  { %v2363_v28 = vadd.f32 %v2362_v49, %v2275_v43  ;;  %v3078_v11 = vpop.f32.mrb[21].mxu1  ;;  %v1330_v39 = vsel %vm64_vm0, %v1329_v38, 0.0  ;;  %v3131_v43 = vpack.c.bf16 %v2557_v35, %v2556_v33 }
 0xe61   :  { %v2366_v29 = vadd.f32 %v2363_v28, %v2287_v36 }
 0xe63   :  { %v2367_v37 = vmul.f32 0.35355338, %v2366_v29 }
 0xe65   :  { %v2368_v9 = vadd.f32 %v3711_v47, %v2367_v37 }
 0xe67   :  { %v2369_v30 = vsel %vm263_vm2, %v2368_v9, -inf }
 0xe68   :  { %2370 = vmax.xlane.f32.xlu1 %v2369_v30 }
 0xe6c   :  { %1331 = vadd.xlane.f32.xlu1 %v1330_v39  ;;  %v2657_v39 = vld [vmem:[%s3909_s11] sm:$0xff] }
 0xef5   :  { %v2371_v40 = vpop.xlane.xlu1 %2370 }
 0xef6   :  { %v2372_v41 = vsub.f32 %v2368_v9, %v2371_v40  ;;  %v2658_v40 = vld [vmem:[%s3909_s11 + $0x8] sm:$0xff] }
 0xef8   :  { %v2373_v44 = vmul.f32 1.442695, %v2372_v41  ;;  %v3135_v41 = vpack.c.bf16 %v2658_v40, %v2657_v39  ;;  %v2887_v40 = vld [vmem:[%s3912_s14] ss:$0 sm:$0xff] }
 0xef9   :  { %v1332_v42 = vpop.xlane.xlu1 %1331 }
 0xefa   :  { %3270 = vpow2.f32 %v2373_v44  ;;  %v1334_v55 = vmul.f32 0.03125, %v1332_v42  ;;  %3136 = vmatprep.subr.bf16.mxu1 %v3135_v41  ;;  %v2659_v44 = vld [vmem:[%s3909_s11 + $0x10] sm:$0xff] }
 0xefc   :  { %v1335_v58 = vsub.f32 %v1329_v38, %v1334_v55 }
 0xefe   :  { %v1336_v1 = vmul.f32 %v1335_v58, %v1335_v58 }
 0xf00   :  { %v1337_v2 = vsel %vm64_vm0, %v1336_v1, 0.0 }
 0xf04   :  { %v3271_v46 = vpop.eup %3270 }
 0xf05   :  { %v2375_v6 = vsel %vm263_vm2, %v3271_v46, 0.0 }
 0xf06   :  { %2376 = vadd.xlane.f32.xlu0 %v2375_v6 }
 0xf1c   :  { %2380 = vrot.lane.b32.xlu0 %v3457_v13, %s3342_s17 }
 0xf2e   :  { %v2251_v47 = vpop.f32.mrb[22].mxu0 }
 0xf2f   :  { %v2255_v48 = vadd.f32 %v2251_v47, %v3764_v51  ;;  %v3073_v16 = vpop.f32.mrb[23].mxu0  ;;  %v2661_v47 = vld [vmem:[%s3909_s11 + $0x20] sm:$0xff] }
 0xf93   :  { %v2377_v50 = vpop.xlane.xlu0 %2376 }
 0xf94   :  { %3272 = vrcp.f32 %v2377_v50  ;;  %v2663_v50 = vld [vmem:[%s3909_s11 + $0x30] sm:$0xff] }
 0xf97   :  { %v2381_v8 = vpop.permute.xlu0 %2380 }
 0xf98   :  { %3080 = vmatpush3.msra.mxu0 %v2381_v8  ;;  %v2664_v8 = vld [vmem:[%s3909_s11 + $0x38] sm:$0xff] }
 0xf99   :  { %3128 = vmatprep.subr.bf16.mxu0 %v3127_v34 }
 0xf9e   :  { %v3273_v15 = vpop.eup %3272 }
 0xf9f   :  { %v2379_v52 = vmul.f32 %v3273_v15, %v3271_v46  ;;  %v2660_v46 = vld [vmem:[%s3909_s11 + $0x18] sm:$0xff]  ;;  %v3147_v15 = vpack.c.bf16 %v2664_v8, %v2663_v50 }
 0xfa0   :  { %v3139_v6 = vpack.c.bf16 %v2660_v46, %v2659_v44 }
 0xfa1   :  { %3082 = vmatmul.mubr.msk.f32.vlgmr.msra.gmra.mrb[24].mxu0 %vm263_vm2, %v2379_v52  ;;  %v2880_v52 = vld [vmem:[%s3908_s10] ss:$0 sm:$0xff] }
 0xfa2   :  { %3130 = vmatpush3.bf16.msra.mxu0 %v3127_v34 }
 0xfa3   :  { %3132 = vmatprep.subr.bf16.mxu0 %v3131_v43 }
 0xfa6   :  { %3134 = vmatpush3.bf16.msra.mxu0 %v3131_v43 }
0x1074   :  { %v2452_v24 = vpop.f32.mrb[24].mxu0 }
0x1075   :  { %v3083_v32 = vpop.f32.mrb[25].mxu0  ;;  %3087 = vmatmul.mubr.msk.f32.vlgmr.msra.gmra.mrb[22].mxu1 %vm263_vm2, %v2452_v24 }
0x1076   :  { %3138 = vmatpush3.bf16.msra.mxu1 %v3135_v41 }
0x1077   :  { %3140 = vmatprep.subr.bf16.mxu1 %v3139_v6 }
0x107a   :  { %3142 = vmatpush3.bf16.msra.mxu1 %v3139_v6 }
0x1148   :  { %v2525_v57 = vpop.f32.mrb[22].mxu1 }
0x1149   :  { %v2529_v13 = vadd.f32 %v2525_v57, %v2255_v48  ;;  %v3088_v62 = vpop.f32.mrb[23].mxu1  ;;  %v2662_v48 = vld [vmem:[%s3909_s11 + $0x28] sm:$0xff] }
0x114a   :  { %v3143_v16 = vpack.c.bf16 %v2662_v48, %v2661_v47 }
0x114b   :  { %v2530_v51 = vadd.f32 %v2856_v59, %v2529_v13 }
0x114c   :  { %3144 = vmatprep.subr.bf16.mxu1 %v3143_v16 }
0x114d   :  { %v2531_v63 = vadd.f32 %v3295_v60, %v2530_v51  ;;  %3146 = vmatpush3.bf16.msra.mxu1 %v3143_v16 }
0x114e   :  { %3148 = vmatprep.subr.bf16.mxu1 %v3147_v15 }
0x114f   :  { %v2532_v0 = vsel %vm64_vm0, %v2531_v63, 0.0 }
0x1150   :  { %2533 = vadd.xlane.f32.xlu1 %v2532_v0 }
0x1151   :  { %3150 = vmatpush3.bf16.msra.mxu1 %v3147_v15 }
0x1154   :  { %1338 = vadd.xlane.f32.xlu1 %v1337_v2 }
0x11dd   :  { %v2534_v3 = vpop.xlane.xlu1 %2533 }
0x11de   :  { %v2535_v4 = vmul.f32 0.03125, %v2534_v3  ;;  %v2883_v3 = vld [vmem:[%s3910_s12] ss:$0 sm:$0xff] }
0x11e0   :  { %v2536_v5 = vsub.f32 %v2531_v63, %v2535_v4 }
0x11e1   :  { %v1339_v7 = vpop.xlane.xlu1 %1338 }
0x11e2   :  { %v1340_v12 = vmul.f32 0.03125, %v1339_v7  ;;  %v2537_v26 = vmul.f32 %v2536_v5, %v2536_v5 }
0x11e4   :  { %v1341_v61 = vadd.f32 1e-12, %v1340_v12  ;;  %v2538_v14 = vsel %vm64_vm0, %v2537_v26, 0.0 }
0x11e5   :  { %2539 = vadd.xlane.f32.xlu1 %v2538_v14 }
0x11e6   :  { %3274 = vrsqrt.f32 %v1341_v61  ;;  %vm1344_vm4 = vcmp.eq.f32.partialorder %v1341_v61, inf  ;;  %v1347_v20 = vand.u32 2147483648, %v1341_v61  ;;  %vm1346_vm5 = vcmp.eq.f32.partialorder %v1341_v61, 0.0 }
0x11f0   :  { %v3275_v18 = vpop.eup %3274 }
0x11f1   :  { %v1343_v19 = vmul.f32 %v3275_v18, %v1341_v61 }
0x11f3   :  { %v1345_v21 = vsel %vm1344_vm4, %v1341_v61, %v1343_v19 }
0x11f4   :  { %v1348_v45 = vsel %vm1346_vm5, %v1347_v20, %v1345_v21 }
0x11f5   :  { %3276 = vrcp.f32 %v1348_v45 }
0x11ff   :  { %v3277_v17 = vpop.eup %3276 }
0x1200   :  { %v1350_v23 = vmul.f32 %v3277_v17, %v1335_v58 }
0x1202   :  { %v1357_v25 = vmul.f32 %v2857_v22, %v1350_v23 }
0x1204   :  { %v3826_v27 = vadd.f32 %v2858_v31, %v1357_v25 }
0x1206   :  { %3097 = vmatprep.mubr.msk.f32.mxu0 %vm64_vm0, %v3826_v27 }
0x1272   :  { %v2540_v49 = vpop.xlane.xlu1 %2539 }
0x1273   :  { %v2541_v36 = vmul.f32 0.03125, %v2540_v49 }
0x1275   :  { %v2542_v28 = vadd.f32 1e-12, %v2541_v36 }
0x1277   :  { %3278 = vrsqrt.f32 %v2542_v28  ;;  %vm2545_vm6 = vcmp.eq.f32.partialorder %v2542_v28, inf  ;;  %v2548_v29 = vand.u32 2147483648, %v2542_v28  ;;  %vm2547_vm7 = vcmp.eq.f32.partialorder %v2542_v28, 0.0 }
0x1281   :  { %v3279_v11 = vpop.eup %3278 }
0x1282   :  { %v2544_v59 = vmul.f32 %v3279_v11, %v2542_v28 }
0x1284   :  { %v2546_v56 = vsel %vm2545_vm6, %v2542_v28, %v2544_v59 }
0x1285   :  { %v2549_v37 = vsel %vm2547_vm7, %v2548_v29, %v2546_v56 }
0x1286   :  { %3280 = vrcp.f32 %v2549_v37 }
0x1290   :  { %v3281_v9 = vpop.eup %3280 }
0x1291   :  { %v2551_v30 = vmul.f32 %v3281_v9, %v2536_v5 }
0x1293   :  { %v2552_v10 = vmul.f32 %v2857_v22, %v2551_v30 }
0x1295   :  { %v2553_v38 = vadd.f32 %v2858_v31, %v2552_v10 }
0x1297   :  { %3098 = vmatmul.mubr.msk.f32.vlgmr.msra.gmra.mrb[26].mxu0 %vm64_vm0, %v2553_v38 }
0x136a   :  { %v3099_v24 = vpop.f32.mrb[26].mxu0 }
0x136b   :  { %v2643_v32 = vadd.f32 %v3099_v24, %v2880_v52  ;;  %v2637_v42 = vpop.f32.mrb[27].mxu0 }
0x136c   :  { %v2638_v55 = vadd.f32 %v2880_v52, %v2637_v42 }
0x136d   :  { %v2650_v57 = vmul.f32 0.70710677, %v2643_v32  ;;  %v2647_v0 = vmul.f32 0.5, %v2643_v32 }
0x136e   :  { %v2649_v13 = vmul.f32 0.70710677, %v2638_v55  ;;  %v2646_v60 = vmul.f32 0.5, %v2638_v55 }
0x136f   :  { %3282 = verf.f32 %v2650_v57 }
0x1370   :  { %3284 = verf.f32 %v2649_v13 }
0x1379   :  { %v3283_v62 = vpop.eup %3282 }
0x137a   :  { %v3285_v58 = vpop.eup %3284  ;;  %v2654_v51 = vadd.f32 1.0, %v3283_v62 }
0x137b   :  { %v2653_v63 = vadd.f32 1.0, %v3285_v58 }
0x137c   :  { %v2656_v2 = vmul.f32 %v2654_v51, %v2647_v0 }
0x137d   :  { %v2655_v1 = vmul.f32 %v2653_v63, %v2646_v60 }
0x137f   :  { %3116 = vmatprep.mubr.msk.f32.mxu1 %vm2672_vm8, %v2655_v1 }
0x1380   :  { %3117 = vmatmul.mubr.msk.f32.vlgmr.msra.gmra.mrb[24].mxu1 %vm2672_vm8, %v2656_v2 }
0x1453   :  { %v3118_v4 = vpop.f32.mrb[24].mxu1 }
0x1454   :  { %v2745_v5 = vpop.f32.mrb[25].mxu1  ;;  %v2751_v7 = vadd.f32 %v3118_v4, %v2883_v3 }
0x1455   :  { %v2746_v12 = vadd.f32 %v2883_v3, %v2745_v5 }
0x1456   :  { %v2755_v14 = vadd.f32 %v2751_v7, %v2553_v38  ;;  %v2886_v38 = vld [vmem:[%s3911_s13] ss:$0 sm:$0xff] }
0x1457   :  { %v2754_v26 = vadd.f32 %v2746_v12, %v3826_v27 }
0x1458   :  { %v2761_v18 = vsel %vm64_vm0, %v2755_v14, 0.0 }
0x1459   :  { %v2758_v61 = vsel %vm64_vm0, %v2754_v26, 0.0 }
0x145a   :  { %2759 = vadd.xlane.f32.xlu1 %v2758_v61 }
0x145e   :  { %2762 = vadd.xlane.f32.xlu1 %v2761_v18 }
0x14e7   :  { %v2760_v19 = vpop.xlane.xlu1 %2759 }
0x14e8   :  { %v2764_v20 = vmul.f32 0.03125, %v2760_v19 }
0x14ea   :  { %v2766_v21 = vsub.f32 %v2754_v26, %v2764_v20 }
0x14eb   :  { %v2763_v45 = vpop.xlane.xlu1 %2762 }
0x14ec   :  { %v2765_v17 = vmul.f32 0.03125, %v2763_v45  ;;  %v2768_v22 = vmul.f32 %v2766_v21, %v2766_v21 }
0x14ee   :  { %v2767_v23 = vsub.f32 %v2755_v14, %v2765_v17  ;;  %v2770_v31 = vsel %vm64_vm0, %v2768_v22, 0.0 }
0x14ef   :  { %2771 = vadd.xlane.f32.xlu0 %v2770_v31 }
0x14f0   :  { %v2769_v25 = vmul.f32 %v2767_v23, %v2767_v23 }
0x14f2   :  { %v2773_v27 = vsel %vm64_vm0, %v2769_v25, 0.0 }
0x14f3   :  { %2774 = vadd.xlane.f32.xlu1 %v2773_v27 }
0x157c   :  { %v2772_v54 = vpop.xlane.xlu0 %2771 }
0x157d   :  { %v2776_v53 = vmul.f32 0.03125, %v2772_v54 }
0x157f   :  { %v2778_v33 = vadd.f32 1e-12, %v2776_v53 }
0x1580   :  { %v2775_v34 = vpop.xlane.xlu1 %2774 }
0x1581   :  { %3286 = vrsqrt.f32 %v2778_v33  ;;  %v2777_v35 = vmul.f32 0.03125, %v2775_v34  ;;  %vm2782_vm9 = vcmp.eq.f32.partialorder %v2778_v33, inf  ;;  %v2785_v28 = vand.u32 2147483648, %v2778_v33 }
0x1582   :  { %vm2784_vm10 = vcmp.eq.f32.partialorder %v2778_v33, 0.0 }
0x1583   :  { %v2779_v43 = vadd.f32 1e-12, %v2777_v35 }
0x1585   :  { %3288 = vrsqrt.f32 %v2779_v43  ;;  %vm2789_vm11 = vcmp.eq.f32.partialorder %v2779_v43, inf  ;;  %v2792_v37 = vand.u32 2147483648, %v2779_v43  ;;  %vm2791_vm12 = vcmp.eq.f32.partialorder %v2779_v43, 0.0 }
0x158b   :  { %v3287_v49 = vpop.eup %3286 }
0x158c   :  { %v2781_v36 = vmul.f32 %v3287_v49, %v2778_v33 }
0x158e   :  { %v2783_v11 = vsel %vm2782_vm9, %v2778_v33, %v2781_v36 }
0x158f   :  { %v2786_v59 = vsel %vm2784_vm10, %v2785_v28, %v2783_v11  ;;  %v3289_v29 = vpop.eup %3288 }
0x1590   :  { %3290 = vrcp.f32 %v2786_v59  ;;  %v2788_v56 = vmul.f32 %v3289_v29, %v2779_v43 }
0x1592   :  { %v2790_v9 = vsel %vm2789_vm11, %v2779_v43, %v2788_v56 }
0x1593   :  { %v2793_v30 = vsel %vm2791_vm12, %v2792_v37, %v2790_v9 }
0x1594   :  { %3292 = vrcp.f32 %v2793_v30 }
0x159a   :  { %v3291_v10 = vpop.eup %3290 }
0x159b   :  { %v2795_v39 = vmul.f32 %v3291_v10, %v2766_v21 }
0x159d   :  { %v2804_v41 = vmul.f32 %v2886_v38, %v2795_v39 }
0x159e   :  { %v3293_v44 = vpop.eup %3292 }
0x159f   :  { %v2812_v46 = vadd.f32 %v2887_v40, %v2804_v41  ;;  %v2797_v6 = vmul.f32 %v3293_v44, %v2767_v23 }
0x15a1   :  { %2814 = vst.msk [vmem:[#allocation2] sm:$0xff] %vm64_vm0, %v2812_v46  ;;  %v2805_v47 = vmul.f32 %v2886_v38, %v2797_v6 }
0x15a3   :  { %v2813_v48 = vadd.f32 %v2887_v40, %v2805_v47 }
0x15a5   :  { %2815 = vst.msk [vmem:[#allocation2 + $0x8] sm:$0xff] %vm64_vm0, %v2813_v48 }
0x15a6   :  { %3307 = shalt.err (!%p3304_p4)
}
0x15a7   :  { %s3308_s2 = scalar_lea.hbm %s3913_s15, 256 }
0x15a8   :  { %p3309_p5 = scmp.ne.s32.totalorder %s3913_s15, %s3308_s2  ;;  %p3312_p6 = scmp.lt.u32.totalorder %s3308_s2, %s3913_s15 }
0x15aa   :  { %p3314_p7 = pnand %p3312_p6, %p3309_p5 }
0x15ac   :  { %3317 = shalt.err (!%p3314_p7)
}
0x15ad   :  { %s3344_s18 = smov 128   ;;  %s3345_s5 = smov 8  }
0x15ae   :  { %2827 = dma.vmem_to_hbm [thread:$0]  %s2822_s23, 256, %s3913_s15, [#allocation3], %s3344_s18, %s3344_s18, %s3345_s5  }
0x15af   :  { %3318 = dma.done.wait [#allocation3], 256  }
0x15b0   :  { %3319 = vsyncadd [#allocation3], 4294967040 }
0x15b1   :  { %2831 = vsyncpa [#allocation3], 1 }

</bundles_post_ra>
